<compile_context>
chip_gen: v7x
topology: tpu7x:2x2x1
jax: 0.10.0
libtpu: 0.0.40
codegen_flags: <defaults>
</compile_context>

<pallas_src>
import functools

import jax
import jax.numpy as jnp
from jax.experimental import pallas as pl
from jax.experimental.pallas import tpu as pltpu


# 3x3 tap offsets, row-major over the kernel window.  The packed weight
# matrix, the tap-mask table and the im2col scratch rows share this ordering.
_TAPS = tuple((dh, dw) for dh in (-1, 0, 1) for dw in (-1, 0, 1))


def _im2col_into(patch_ref, a, masks_ref, *, W, C):
    """Write the (9*C, H*W) bf16 im2col patch matrix of `a` (C, H*W) f32.

    3x3 / stride-1 / pad-1 taps.  Each tap is a lane rotation of `a`
    (out[p] = a[p + dh*W + dw]) followed by a validity select that zeroes
    positions whose source pixel lies in the zero padding (this also kills
    the row/column wrap-around of the circular rotation).
    """
    hw = a.shape[-1]
    for t, (dh, dw) in enumerate(_TAPS):
        s = dh * W + dw
        if s == 0:
            tap = a  # center tap: no shift, always valid
        else:
            # pltpu.roll matches jnp.roll: out[p] = x[(p - shift) % n];
            # we want out[p] = x[(p + s) % n]  =>  shift = (-s) % n.
            shifted = pltpu.roll(a, shift=(-s) % hw, axis=1)
            # select (not multiply) so non-finite border values cannot leak.
            tap = jnp.where(masks_ref[t:t + 1, :] > 0.5, shifted, 0.0)
        patch_ref[pl.ds(t * C, C), :] = tap.astype(patch_ref.dtype)


def basic_block_kernel(x_ref, masks_ref, w1_ref, w2_ref, sh1_ref, sh2_ref,
                       o_ref, patch_ref, *, W, C):
    # Per-grid-step shapes:
    #   x_ref   : (NB, C, H*W) f32   channels on sublanes, flat spatial on lanes
    #   masks   : (9, H*W)     f32   per-tap validity masks (0/1)
    #   w1/w2   : (C, 9*C)     bf16  packed weights with BN scale folded in:
    #                                 w[co, (kh*3+kw)*C + ci] * bn_scale[co]
    #   sh1/sh2 : (C, 1)       f32   folded BN shift (beta - mean*scale)
    #   o_ref   : (NB, C, H*W) f32
    #   patch   : (9*C, H*W)   bf16  reused im2col scratch (conv1 and conv2)
    nb = x_ref.shape[0]
    for b in range(nb):  # static unroll; NB small, amortizes per-step overhead
        x = x_ref[b]  # (C, H*W) f32 -- also the residual

        # conv1 (one bf16 MXU matmul, f32 accumulate) -> +bn1 shift -> relu
        _im2col_into(patch_ref, x, masks_ref, W=W, C=C)
        h = jnp.dot(w1_ref[...], patch_ref[...],
                    preferred_element_type=jnp.float32)
        h = jnp.maximum(h + sh1_ref[...], 0.0)

        # conv2 -> +bn2 shift -> residual add -> relu
        _im2col_into(patch_ref, h, masks_ref, W=W, C=C)
        h = jnp.dot(w2_ref[...], patch_ref[...],
                    preferred_element_type=jnp.float32)
        o_ref[b] = jnp.maximum(h + sh2_ref[...] + x, 0.0)


def _fold_bn(gamma, beta, mean, var, eps=1e-5):
    scale = gamma / jnp.sqrt(var + eps)
    shift = beta - mean * scale
    return scale.reshape(-1, 1), shift.reshape(-1, 1)


def _tap_masks(H, W):
    """(9, H*W) f32 validity masks for the 3x3 taps with zero padding of 1."""
    yy, xx = jnp.meshgrid(jnp.arange(H), jnp.arange(W), indexing="ij")
    yy = yy.reshape(-1)
    xx = xx.reshape(-1)
    rows = []
    for dh, dw in _TAPS:
        ok = (yy + dh >= 0) & (yy + dh < H) & (xx + dw >= 0) & (xx + dw < W)
        rows.append(ok.astype(jnp.float32))
    return jnp.stack(rows, axis=0)


def _pick_batch_block(N, C, HW):
    """Batch elements fused per grid step.

    Fuse as many as possible to amortize per-step overhead, but keep >=2 grid
    steps when N >= 2 (so v7x's two TensorCores both get work) and keep the
    activation block modest in VMEM.
    """
    best = 1
    for d in range(1, N + 1):
        if N % d:
            continue
        if N >= 2 and N // d < 2:
            continue
        if d * C * HW * 4 > (4 << 20):
            continue
        best = d
    return best


def basic_block(x_nchw, w1_oihw, w2_oihw, bn1, bn2):
    """x: (N, C, H, W) NCHW; w1/w2: (C, C, 3, 3) OIHW (PyTorch layout);
    bn1/bn2: (gamma, beta, running_mean, running_var) eval-mode stats."""
    N, C, H, W = x_nchw.shape
    HW = H * W
    NB = _pick_batch_block(N, C, HW)

    # Free reshape (contiguous dim collapse) -- no host transpose or pad.
    x_flat = x_nchw.reshape(N, C, HW).astype(jnp.float32)

    s1, sh1 = _fold_bn(*bn1)
    s2, sh2 = _fold_bn(*bn2)

    def pack_w(w, scale):
        # OIHW -> (C_out, 9*C_in); column index = (kh*3+kw)*C_in + ci.
        # BN scale folded per output channel, then cast to bf16 for the MXU.
        co, ci = w.shape[0], w.shape[1]
        m = jnp.transpose(w, (0, 2, 3, 1)).reshape(co, 9 * ci).astype(jnp.float32)
        return (m * scale).astype(jnp.bfloat16)

    w1_mat = pack_w(w1_oihw, s1)
    w2_mat = pack_w(w2_oihw, s2)
    masks = _tap_masks(H, W)

    flops = 2 * 2 * N * HW * 9 * C * C  # two 3x3 convs, 2 flops per MAC
    bytes_accessed = (4 * 2 * N * C * HW        # activations in + out (f32)
                      + 2 * 2 * C * 9 * C       # two bf16 weight matrices
                      + 4 * 9 * HW + 4 * 2 * C)  # masks + shifts

    out_flat = pl.pallas_call(
        functools.partial(basic_block_kernel, W=W, C=C),
        out_shape=jax.ShapeDtypeStruct((N, C, HW), jnp.float32),
        grid_spec=pltpu.PrefetchScalarGridSpec(
            num_scalar_prefetch=0,
            grid=(N // NB,),
            in_specs=[
                pl.BlockSpec((NB, C, HW), lambda n: (n, 0, 0)),
                pl.BlockSpec((9, HW), lambda n: (0, 0)),
                pl.BlockSpec((C, 9 * C), lambda n: (0, 0)),
                pl.BlockSpec((C, 9 * C), lambda n: (0, 0)),
                pl.BlockSpec((C, 1), lambda n: (0, 0)),
                pl.BlockSpec((C, 1), lambda n: (0, 0)),
            ],
            out_specs=pl.BlockSpec((NB, C, HW), lambda n: (n, 0, 0)),
            scratch_shapes=[pltpu.VMEM((9 * C, HW), jnp.bfloat16)],
        ),
        compiler_params=pltpu.CompilerParams(
            dimension_semantics=("parallel",)),
        cost_estimate=pl.CostEstimate(
            flops=flops, transcendentals=0, bytes_accessed=bytes_accessed),
    )(x_flat, masks, w1_mat, w2_mat, sh1, sh2)

    return out_flat.reshape(N, C, H, W)


def reference(x_nchw, w1, w2, bn1, bn2):
    """Pure-JAX reference matching the PyTorch forward (eval-mode BN)."""
    def conv(x, w):
        return jax.lax.conv_general_dilated(
            x, w, window_strides=(1, 1), padding=((1, 1), (1, 1)),
            dimension_numbers=("NCHW", "OIHW", "NCHW"),
            precision=jax.lax.Precision.HIGHEST)

    def bn(x, params):
        g, b, m, v = params
        s = g / jnp.sqrt(v + 1e-5)
        return x * s.reshape(1, -1, 1, 1) + (b - m * s).reshape(1, -1, 1, 1)

    out = jax.nn.relu(bn(conv(x_nchw, w1), bn1))
    out = bn(conv(out, w2), bn2)
    return jax.nn.relu(out + x_nchw)


if __name__ == "__main__":
    key = jax.random.PRNGKey(0)
    keys = jax.random.split(key, 11)

    # Small shapes: batch=2, inplanes=planes=16 (multiple of 16 for clean bf16
    # sublane packing), spatial=16x16 (HW=256, a lane multiple), NCHW input.
    N, C, H, W = 2, 16, 16, 16
    x = jax.random.normal(keys[0], (N, C, H, W), jnp.float32)

    fan_in = C * 9
    w1 = jax.random.normal(keys[1], (C, C, 3, 3), jnp.float32) / jnp.sqrt(fan_in)
    w2 = jax.random.normal(keys[2], (C, C, 3, 3), jnp.float32) / jnp.sqrt(fan_in)

    bn1 = (1.0 + 0.1 * jax.random.normal(keys[3], (C,), jnp.float32),   # gamma
           0.1 * jax.random.normal(keys[4], (C,), jnp.float32),          # beta
           0.1 * jax.random.normal(keys[5], (C,), jnp.float32),          # running_mean
           1.0 + 0.1 * jnp.abs(jax.random.normal(keys[6], (C,), jnp.float32)))  # running_var
    bn2 = (1.0 + 0.1 * jax.random.normal(keys[7], (C,), jnp.float32),
           0.1 * jax.random.normal(keys[8], (C,), jnp.float32),
           0.1 * jax.random.normal(keys[9], (C,), jnp.float32),
           1.0 + 0.1 * jnp.abs(jax.random.normal(keys[10], (C,), jnp.float32)))

    out = basic_block(x, w1, w2, bn1, bn2)
    out = jax.block_until_ready(out)

    ref = jax.block_until_ready(reference(x, w1, w2, bn1, bn2))
    assert out.shape == (N, C, H, W)
    # Tolerance accounts for bf16 MXU operands (f32 accumulation) vs f32 ref.
    assert jnp.allclose(out, ref, atol=5e-2, rtol=5e-2), "mismatch vs reference"

    print("KERNEL_OK")
</pallas_src>

<mosaic_0001>
module attributes {stable_mosaic.version = 11 : i64} {
  func.func @basic_block_kernel(%arg0: i32, %arg1: memref<1x16x256xf32, #tpu.memory_space<vmem>>, %arg2: memref<9x256xf32, #tpu.memory_space<vmem>>, %arg3: memref<16x144xbf16, #tpu.memory_space<vmem>>, %arg4: memref<16x144xbf16, #tpu.memory_space<vmem>>, %arg5: memref<16x1xf32, #tpu.memory_space<vmem>>, %arg6: memref<16x1xf32, #tpu.memory_space<vmem>>, %arg7: memref<1x16x256xf32, #tpu.memory_space<vmem>>, %arg8: memref<144x256xbf16, #tpu.memory_space<vmem>>) attributes {dimension_semantics = [#tpu.dimension_semantics<parallel>], iteration_bounds = array<i64: 2>, scalar_prefetch = 0 : i64, scratch_operands = 1 : i64, tpu.core_type = #tpu.core_type<tc>, window_params = [{transform_indices = @transform_0, window_bounds = array<i64: 1, 16, 256>}, {pipeline_mode = #tpu.pipeline_mode<synchronous>, transform_indices = @transform_1, window_bounds = array<i64: 9, 256>}, {pipeline_mode = #tpu.pipeline_mode<synchronous>, transform_indices = @transform_2, window_bounds = array<i64: 16, 144>}, {pipeline_mode = #tpu.pipeline_mode<synchronous>, transform_indices = @transform_3, window_bounds = array<i64: 16, 144>}, {pipeline_mode = #tpu.pipeline_mode<synchronous>, transform_indices = @transform_4, window_bounds = array<i64: 16, 1>}, {pipeline_mode = #tpu.pipeline_mode<synchronous>, transform_indices = @transform_5, window_bounds = array<i64: 16, 1>}, {transform_indices = @transform_6, window_bounds = array<i64: 1, 16, 256>}]} {
    %c0 = arith.constant 0 : index
    %c0_0 = arith.constant 0 : index
    %c0_1 = arith.constant 0 : index
    %0 = vector.load %arg1[%c0, %c0_0, %c0_1] : memref<1x16x256xf32, #tpu.memory_space<vmem>>, vector<1x16x256xf32>
    %1 = vector.shape_cast %0 : vector<1x16x256xf32> to vector<16x256xf32>
    %c17_i32 = arith.constant 17 : i32
    %2 = tpu.dynamic_rotate %1 by %c17_i32 dim 1 : vector<16x256xf32>, i32 -> vector<16x256xf32>
    %c0_2 = arith.constant 0 : index
    %c0_3 = arith.constant 0 : index
    %3 = vector.load %arg2[%c0_2, %c0_3] : memref<9x256xf32, #tpu.memory_space<vmem>>, vector<1x256xf32>
    %cst = arith.constant 5.000000e-01 : f32
    %4 = vector.broadcast %cst : f32 to vector<1x256xf32>
    %5 = arith.cmpf ogt, %3, %4 : vector<1x256xf32>
    %cst_4 = arith.constant 0.000000e+00 : f32
    %6 = vector.shape_cast %5 : vector<1x256xi1> to vector<1x256xi1>
    %7 = vector.broadcast %6 : vector<1x256xi1> to vector<16x256xi1>
    %8 = vector.broadcast %cst_4 : f32 to vector<16x256xf32>
    %9 = arith.select %7, %2, %8 : vector<16x256xi1>, vector<16x256xf32>
    %10 = arith.truncf %9 : vector<16x256xf32> to vector<16x256xbf16>
    %c0_5 = arith.constant 0 : index
    %c0_6 = arith.constant 0 : index
    %11 = vector.load %arg8[%c0_5, %c0_6] : memref<144x256xbf16, #tpu.memory_space<vmem>>, vector<16x256xbf16>
    tpu.vector_store %arg8[%c0_5, %c0_6], %10 {strides = array<i32>} : memref<144x256xbf16, #tpu.memory_space<vmem>>, vector<16x256xbf16>,
    %c16_i32 = arith.constant 16 : i32
    %12 = tpu.dynamic_rotate %1 by %c16_i32 dim 1 : vector<16x256xf32>, i32 -> vector<16x256xf32>
    %c1 = arith.constant 1 : index
    %c0_7 = arith.constant 0 : index
    %13 = vector.load %arg2[%c1, %c0_7] : memref<9x256xf32, #tpu.memory_space<vmem>>, vector<1x256xf32>
    %cst_8 = arith.constant 5.000000e-01 : f32
    %14 = vector.broadcast %cst_8 : f32 to vector<1x256xf32>
    %15 = arith.cmpf ogt, %13, %14 : vector<1x256xf32>
    %cst_9 = arith.constant 0.000000e+00 : f32
    %16 = vector.shape_cast %15 : vector<1x256xi1> to vector<1x256xi1>
    %17 = vector.broadcast %16 : vector<1x256xi1> to vector<16x256xi1>
    %18 = vector.broadcast %cst_9 : f32 to vector<16x256xf32>
    %19 = arith.select %17, %12, %18 : vector<16x256xi1>, vector<16x256xf32>
    %20 = arith.truncf %19 : vector<16x256xf32> to vector<16x256xbf16>
    %c16 = arith.constant 16 : index
    %c0_10 = arith.constant 0 : index
    %21 = vector.load %arg8[%c16, %c0_10] : memref<144x256xbf16, #tpu.memory_space<vmem>>, vector<16x256xbf16>
    tpu.vector_store %arg8[%c16, %c0_10], %20 {strides = array<i32>} : memref<144x256xbf16, #tpu.memory_space<vmem>>, vector<16x256xbf16>,
    %c15_i32 = arith.constant 15 : i32
    %22 = tpu.dynamic_rotate %1 by %c15_i32 dim 1 : vector<16x256xf32>, i32 -> vector<16x256xf32>
    %c2 = arith.constant 2 : index
    %c0_11 = arith.constant 0 : index
    %23 = vector.load %arg2[%c2, %c0_11] : memref<9x256xf32, #tpu.memory_space<vmem>>, vector<1x256xf32>
    %cst_12 = arith.constant 5.000000e-01 : f32
    %24 = vector.broadcast %cst_12 : f32 to vector<1x256xf32>
    %25 = arith.cmpf ogt, %23, %24 : vector<1x256xf32>
    %cst_13 = arith.constant 0.000000e+00 : f32
    %26 = vector.shape_cast %25 : vector<1x256xi1> to vector<1x256xi1>
    %27 = vector.broadcast %26 : vector<1x256xi1> to vector<16x256xi1>
    %28 = vector.broadcast %cst_13 : f32 to vector<16x256xf32>
    %29 = arith.select %27, %22, %28 : vector<16x256xi1>, vector<16x256xf32>
    %30 = arith.truncf %29 : vector<16x256xf32> to vector<16x256xbf16>
    %c32 = arith.constant 32 : index
    %c0_14 = arith.constant 0 : index
    %31 = vector.load %arg8[%c32, %c0_14] : memref<144x256xbf16, #tpu.memory_space<vmem>>, vector<16x256xbf16>
    tpu.vector_store %arg8[%c32, %c0_14], %30 {strides = array<i32>} : memref<144x256xbf16, #tpu.memory_space<vmem>>, vector<16x256xbf16>,
    %c1_i32 = arith.constant 1 : i32
    %32 = tpu.dynamic_rotate %1 by %c1_i32 dim 1 : vector<16x256xf32>, i32 -> vector<16x256xf32>
    %c3 = arith.constant 3 : index
    %c0_15 = arith.constant 0 : index
    %33 = vector.load %arg2[%c3, %c0_15] : memref<9x256xf32, #tpu.memory_space<vmem>>, vector<1x256xf32>
    %cst_16 = arith.constant 5.000000e-01 : f32
    %34 = vector.broadcast %cst_16 : f32 to vector<1x256xf32>
    %35 = arith.cmpf ogt, %33, %34 : vector<1x256xf32>
    %cst_17 = arith.constant 0.000000e+00 : f32
    %36 = vector.shape_cast %35 : vector<1x256xi1> to vector<1x256xi1>
    %37 = vector.broadcast %36 : vector<1x256xi1> to vector<16x256xi1>
    %38 = vector.broadcast %cst_17 : f32 to vector<16x256xf32>
    %39 = arith.select %37, %32, %38 : vector<16x256xi1>, vector<16x256xf32>
    %40 = arith.truncf %39 : vector<16x256xf32> to vector<16x256xbf16>
    %c48 = arith.constant 48 : index
    %c0_18 = arith.constant 0 : index
    %41 = vector.load %arg8[%c48, %c0_18] : memref<144x256xbf16, #tpu.memory_space<vmem>>, vector<16x256xbf16>
    tpu.vector_store %arg8[%c48, %c0_18], %40 {strides = array<i32>} : memref<144x256xbf16, #tpu.memory_space<vmem>>, vector<16x256xbf16>,
    %42 = arith.truncf %1 : vector<16x256xf32> to vector<16x256xbf16>
    %c64 = arith.constant 64 : index
    %c0_19 = arith.constant 0 : index
    %43 = vector.load %arg8[%c64, %c0_19] : memref<144x256xbf16, #tpu.memory_space<vmem>>, vector<16x256xbf16>
    tpu.vector_store %arg8[%c64, %c0_19], %42 {strides = array<i32>} : memref<144x256xbf16, #tpu.memory_space<vmem>>, vector<16x256xbf16>,
    %c255_i32 = arith.constant 255 : i32
    %44 = tpu.dynamic_rotate %1 by %c255_i32 dim 1 : vector<16x256xf32>, i32 -> vector<16x256xf32>
    %c5 = arith.constant 5 : index
    %c0_20 = arith.constant 0 : index
    %45 = vector.load %arg2[%c5, %c0_20] : memref<9x256xf32, #tpu.memory_space<vmem>>, vector<1x256xf32>
    %cst_21 = arith.constant 5.000000e-01 : f32
    %46 = vector.broadcast %cst_21 : f32 to vector<1x256xf32>
    %47 = arith.cmpf ogt, %45, %46 : vector<1x256xf32>
    %cst_22 = arith.constant 0.000000e+00 : f32
    %48 = vector.shape_cast %47 : vector<1x256xi1> to vector<1x256xi1>
    %49 = vector.broadcast %48 : vector<1x256xi1> to vector<16x256xi1>
    %50 = vector.broadcast %cst_22 : f32 to vector<16x256xf32>
    %51 = arith.select %49, %44, %50 : vector<16x256xi1>, vector<16x256xf32>
    %52 = arith.truncf %51 : vector<16x256xf32> to vector<16x256xbf16>
    %c80 = arith.constant 80 : index
    %c0_23 = arith.constant 0 : index
    %53 = vector.load %arg8[%c80, %c0_23] : memref<144x256xbf16, #tpu.memory_space<vmem>>, vector<16x256xbf16>
    tpu.vector_store %arg8[%c80, %c0_23], %52 {strides = array<i32>} : memref<144x256xbf16, #tpu.memory_space<vmem>>, vector<16x256xbf16>,
    %c241_i32 = arith.constant 241 : i32
    %54 = tpu.dynamic_rotate %1 by %c241_i32 dim 1 : vector<16x256xf32>, i32 -> vector<16x256xf32>
    %c6 = arith.constant 6 : index
    %c0_24 = arith.constant 0 : index
    %55 = vector.load %arg2[%c6, %c0_24] : memref<9x256xf32, #tpu.memory_space<vmem>>, vector<1x256xf32>
    %cst_25 = arith.constant 5.000000e-01 : f32
    %56 = vector.broadcast %cst_25 : f32 to vector<1x256xf32>
    %57 = arith.cmpf ogt, %55, %56 : vector<1x256xf32>
    %cst_26 = arith.constant 0.000000e+00 : f32
    %58 = vector.shape_cast %57 : vector<1x256xi1> to vector<1x256xi1>
    %59 = vector.broadcast %58 : vector<1x256xi1> to vector<16x256xi1>
    %60 = vector.broadcast %cst_26 : f32 to vector<16x256xf32>
    %61 = arith.select %59, %54, %60 : vector<16x256xi1>, vector<16x256xf32>
    %62 = arith.truncf %61 : vector<16x256xf32> to vector<16x256xbf16>
    %c96 = arith.constant 96 : index
    %c0_27 = arith.constant 0 : index
    %63 = vector.load %arg8[%c96, %c0_27] : memref<144x256xbf16, #tpu.memory_space<vmem>>, vector<16x256xbf16>
    tpu.vector_store %arg8[%c96, %c0_27], %62 {strides = array<i32>} : memref<144x256xbf16, #tpu.memory_space<vmem>>, vector<16x256xbf16>,
    %c240_i32 = arith.constant 240 : i32
    %64 = tpu.dynamic_rotate %1 by %c240_i32 dim 1 : vector<16x256xf32>, i32 -> vector<16x256xf32>
    %c7 = arith.constant 7 : index
    %c0_28 = arith.constant 0 : index
    %65 = vector.load %arg2[%c7, %c0_28] : memref<9x256xf32, #tpu.memory_space<vmem>>, vector<1x256xf32>
    %cst_29 = arith.constant 5.000000e-01 : f32
    %66 = vector.broadcast %cst_29 : f32 to vector<1x256xf32>
    %67 = arith.cmpf ogt, %65, %66 : vector<1x256xf32>
    %cst_30 = arith.constant 0.000000e+00 : f32
    %68 = vector.shape_cast %67 : vector<1x256xi1> to vector<1x256xi1>
    %69 = vector.broadcast %68 : vector<1x256xi1> to vector<16x256xi1>
    %70 = vector.broadcast %cst_30 : f32 to vector<16x256xf32>
    %71 = arith.select %69, %64, %70 : vector<16x256xi1>, vector<16x256xf32>
    %72 = arith.truncf %71 : vector<16x256xf32> to vector<16x256xbf16>
    %c112 = arith.constant 112 : index
    %c0_31 = arith.constant 0 : index
    %73 = vector.load %arg8[%c112, %c0_31] : memref<144x256xbf16, #tpu.memory_space<vmem>>, vector<16x256xbf16>
    tpu.vector_store %arg8[%c112, %c0_31], %72 {strides = array<i32>} : memref<144x256xbf16, #tpu.memory_space<vmem>>, vector<16x256xbf16>,
    %c239_i32 = arith.constant 239 : i32
    %74 = tpu.dynamic_rotate %1 by %c239_i32 dim 1 : vector<16x256xf32>, i32 -> vector<16x256xf32>
    %c8 = arith.constant 8 : index
    %c0_32 = arith.constant 0 : index
    %75 = vector.load %arg2[%c8, %c0_32] : memref<9x256xf32, #tpu.memory_space<vmem>>, vector<1x256xf32>
    %cst_33 = arith.constant 5.000000e-01 : f32
    %76 = vector.broadcast %cst_33 : f32 to vector<1x256xf32>
    %77 = arith.cmpf ogt, %75, %76 : vector<1x256xf32>
    %cst_34 = arith.constant 0.000000e+00 : f32
    %78 = vector.shape_cast %77 : vector<1x256xi1> to vector<1x256xi1>
    %79 = vector.broadcast %78 : vector<1x256xi1> to vector<16x256xi1>
    %80 = vector.broadcast %cst_34 : f32 to vector<16x256xf32>
    %81 = arith.select %79, %74, %80 : vector<16x256xi1>, vector<16x256xf32>
    %82 = arith.truncf %81 : vector<16x256xf32> to vector<16x256xbf16>
    %c128 = arith.constant 128 : index
    %c0_35 = arith.constant 0 : index
    %83 = vector.load %arg8[%c128, %c0_35] : memref<144x256xbf16, #tpu.memory_space<vmem>>, vector<16x256xbf16>
    tpu.vector_store %arg8[%c128, %c0_35], %82 {strides = array<i32>} : memref<144x256xbf16, #tpu.memory_space<vmem>>, vector<16x256xbf16>,
    %c0_36 = arith.constant 0 : index
    %c0_37 = arith.constant 0 : index
    %84 = vector.load %arg3[%c0_36, %c0_37] : memref<16x144xbf16, #tpu.memory_space<vmem>>, vector<16x144xbf16>
    %c0_38 = arith.constant 0 : index
    %c0_39 = arith.constant 0 : index
    %85 = vector.load %arg8[%c0_38, %c0_39] : memref<144x256xbf16, #tpu.memory_space<vmem>>, vector<144x256xbf16>
    %cst_40 = arith.constant dense<0.000000e+00> : vector<16x256xf32>
    %86 = tpu.matmul %84, %85, %cst_40 {dimension_numbers = #tpu.dot_dimension_numbers<[1], [0], [0], [1], [0, 0, 1, 1], [], []>} : vector<16x144xbf16>, vector<144x256xbf16>, vector<16x256xf32> -> vector<16x256xf32>
    %c0_41 = arith.constant 0 : index
    %c0_42 = arith.constant 0 : index
    %87 = vector.load %arg5[%c0_41, %c0_42] : memref<16x1xf32, #tpu.memory_space<vmem>>, vector<16x1xf32>
    %88 = vector.broadcast %87 : vector<16x1xf32> to vector<16x256xf32>
    %89 = arith.addf %86, %88 : vector<16x256xf32>
    %cst_43 = arith.constant 0.000000e+00 : f32
    %90 = vector.broadcast %cst_43 : f32 to vector<16x256xf32>
    %91 = arith.maximumf %89, %90 : vector<16x256xf32>
    %c17_i32_44 = arith.constant 17 : i32
    %92 = tpu.dynamic_rotate %91 by %c17_i32_44 dim 1 : vector<16x256xf32>, i32 -> vector<16x256xf32>
    %c0_45 = arith.constant 0 : index
    %c0_46 = arith.constant 0 : index
    %93 = vector.load %arg2[%c0_45, %c0_46] : memref<9x256xf32, #tpu.memory_space<vmem>>, vector<1x256xf32>
    %cst_47 = arith.constant 5.000000e-01 : f32
    %94 = vector.broadcast %cst_47 : f32 to vector<1x256xf32>
    %95 = arith.cmpf ogt, %93, %94 : vector<1x256xf32>
    %cst_48 = arith.constant 0.000000e+00 : f32
    %96 = vector.shape_cast %95 : vector<1x256xi1> to vector<1x256xi1>
    %97 = vector.broadcast %96 : vector<1x256xi1> to vector<16x256xi1>
    %98 = vector.broadcast %cst_48 : f32 to vector<16x256xf32>
    %99 = arith.select %97, %92, %98 : vector<16x256xi1>, vector<16x256xf32>
    %100 = arith.truncf %99 : vector<16x256xf32> to vector<16x256xbf16>
    %c0_49 = arith.constant 0 : index
    %c0_50 = arith.constant 0 : index
    %101 = vector.load %arg8[%c0_49, %c0_50] : memref<144x256xbf16, #tpu.memory_space<vmem>>, vector<16x256xbf16>
    tpu.vector_store %arg8[%c0_49, %c0_50], %100 {strides = array<i32>} : memref<144x256xbf16, #tpu.memory_space<vmem>>, vector<16x256xbf16>,
    %c16_i32_51 = arith.constant 16 : i32
    %102 = tpu.dynamic_rotate %91 by %c16_i32_51 dim 1 : vector<16x256xf32>, i32 -> vector<16x256xf32>
    %c1_52 = arith.constant 1 : index
    %c0_53 = arith.constant 0 : index
    %103 = vector.load %arg2[%c1_52, %c0_53] : memref<9x256xf32, #tpu.memory_space<vmem>>, vector<1x256xf32>
    %cst_54 = arith.constant 5.000000e-01 : f32
    %104 = vector.broadcast %cst_54 : f32 to vector<1x256xf32>
    %105 = arith.cmpf ogt, %103, %104 : vector<1x256xf32>
    %cst_55 = arith.constant 0.000000e+00 : f32
    %106 = vector.shape_cast %105 : vector<1x256xi1> to vector<1x256xi1>
    %107 = vector.broadcast %106 : vector<1x256xi1> to vector<16x256xi1>
    %108 = vector.broadcast %cst_55 : f32 to vector<16x256xf32>
    %109 = arith.select %107, %102, %108 : vector<16x256xi1>, vector<16x256xf32>
    %110 = arith.truncf %109 : vector<16x256xf32> to vector<16x256xbf16>
    %c16_56 = arith.constant 16 : index
    %c0_57 = arith.constant 0 : index
    %111 = vector.load %arg8[%c16_56, %c0_57] : memref<144x256xbf16, #tpu.memory_space<vmem>>, vector<16x256xbf16>
    tpu.vector_store %arg8[%c16_56, %c0_57], %110 {strides = array<i32>} : memref<144x256xbf16, #tpu.memory_space<vmem>>, vector<16x256xbf16>,
    %c15_i32_58 = arith.constant 15 : i32
    %112 = tpu.dynamic_rotate %91 by %c15_i32_58 dim 1 : vector<16x256xf32>, i32 -> vector<16x256xf32>
    %c2_59 = arith.constant 2 : index
    %c0_60 = arith.constant 0 : index
    %113 = vector.load %arg2[%c2_59, %c0_60] : memref<9x256xf32, #tpu.memory_space<vmem>>, vector<1x256xf32>
    %cst_61 = arith.constant 5.000000e-01 : f32
    %114 = vector.broadcast %cst_61 : f32 to vector<1x256xf32>
    %115 = arith.cmpf ogt, %113, %114 : vector<1x256xf32>
    %cst_62 = arith.constant 0.000000e+00 : f32
    %116 = vector.shape_cast %115 : vector<1x256xi1> to vector<1x256xi1>
    %117 = vector.broadcast %116 : vector<1x256xi1> to vector<16x256xi1>
    %118 = vector.broadcast %cst_62 : f32 to vector<16x256xf32>
    %119 = arith.select %117, %112, %118 : vector<16x256xi1>, vector<16x256xf32>
    %120 = arith.truncf %119 : vector<16x256xf32> to vector<16x256xbf16>
    %c32_63 = arith.constant 32 : index
    %c0_64 = arith.constant 0 : index
    %121 = vector.load %arg8[%c32_63, %c0_64] : memref<144x256xbf16, #tpu.memory_space<vmem>>, vector<16x256xbf16>
    tpu.vector_store %arg8[%c32_63, %c0_64], %120 {strides = array<i32>} : memref<144x256xbf16, #tpu.memory_space<vmem>>, vector<16x256xbf16>,
    %c1_i32_65 = arith.constant 1 : i32
    %122 = tpu.dynamic_rotate %91 by %c1_i32_65 dim 1 : vector<16x256xf32>, i32 -> vector<16x256xf32>
    %c3_66 = arith.constant 3 : index
    %c0_67 = arith.constant 0 : index
    %123 = vector.load %arg2[%c3_66, %c0_67] : memref<9x256xf32, #tpu.memory_space<vmem>>, vector<1x256xf32>
    %cst_68 = arith.constant 5.000000e-01 : f32
    %124 = vector.broadcast %cst_68 : f32 to vector<1x256xf32>
    %125 = arith.cmpf ogt, %123, %124 : vector<1x256xf32>
    %cst_69 = arith.constant 0.000000e+00 : f32
    %126 = vector.shape_cast %125 : vector<1x256xi1> to vector<1x256xi1>
    %127 = vector.broadcast %126 : vector<1x256xi1> to vector<16x256xi1>
    %128 = vector.broadcast %cst_69 : f32 to vector<16x256xf32>
    %129 = arith.select %127, %122, %128 : vector<16x256xi1>, vector<16x256xf32>
    %130 = arith.truncf %129 : vector<16x256xf32> to vector<16x256xbf16>
    %c48_70 = arith.constant 48 : index
    %c0_71 = arith.constant 0 : index
    %131 = vector.load %arg8[%c48_70, %c0_71] : memref<144x256xbf16, #tpu.memory_space<vmem>>, vector<16x256xbf16>
    tpu.vector_store %arg8[%c48_70, %c0_71], %130 {strides = array<i32>} : memref<144x256xbf16, #tpu.memory_space<vmem>>, vector<16x256xbf16>,
    %132 = arith.truncf %91 : vector<16x256xf32> to vector<16x256xbf16>
    %c64_72 = arith.constant 64 : index
    %c0_73 = arith.constant 0 : index
    %133 = vector.load %arg8[%c64_72, %c0_73] : memref<144x256xbf16, #tpu.memory_space<vmem>>, vector<16x256xbf16>
    tpu.vector_store %arg8[%c64_72, %c0_73], %132 {strides = array<i32>} : memref<144x256xbf16, #tpu.memory_space<vmem>>, vector<16x256xbf16>,
    %c255_i32_74 = arith.constant 255 : i32
    %134 = tpu.dynamic_rotate %91 by %c255_i32_74 dim 1 : vector<16x256xf32>, i32 -> vector<16x256xf32>
    %c5_75 = arith.constant 5 : index
    %c0_76 = arith.constant 0 : index
    %135 = vector.load %arg2[%c5_75, %c0_76] : memref<9x256xf32, #tpu.memory_space<vmem>>, vector<1x256xf32>
    %cst_77 = arith.constant 5.000000e-01 : f32
    %136 = vector.broadcast %cst_77 : f32 to vector<1x256xf32>
    %137 = arith.cmpf ogt, %135, %136 : vector<1x256xf32>
    %cst_78 = arith.constant 0.000000e+00 : f32
    %138 = vector.shape_cast %137 : vector<1x256xi1> to vector<1x256xi1>
    %139 = vector.broadcast %138 : vector<1x256xi1> to vector<16x256xi1>
    %140 = vector.broadcast %cst_78 : f32 to vector<16x256xf32>
    %141 = arith.select %139, %134, %140 : vector<16x256xi1>, vector<16x256xf32>
    %142 = arith.truncf %141 : vector<16x256xf32> to vector<16x256xbf16>
    %c80_79 = arith.constant 80 : index
    %c0_80 = arith.constant 0 : index
    %143 = vector.load %arg8[%c80_79, %c0_80] : memref<144x256xbf16, #tpu.memory_space<vmem>>, vector<16x256xbf16>
    tpu.vector_store %arg8[%c80_79, %c0_80], %142 {strides = array<i32>} : memref<144x256xbf16, #tpu.memory_space<vmem>>, vector<16x256xbf16>,
    %c241_i32_81 = arith.constant 241 : i32
    %144 = tpu.dynamic_rotate %91 by %c241_i32_81 dim 1 : vector<16x256xf32>, i32 -> vector<16x256xf32>
    %c6_82 = arith.constant 6 : index
    %c0_83 = arith.constant 0 : index
    %145 = vector.load %arg2[%c6_82, %c0_83] : memref<9x256xf32, #tpu.memory_space<vmem>>, vector<1x256xf32>
    %cst_84 = arith.constant 5.000000e-01 : f32
    %146 = vector.broadcast %cst_84 : f32 to vector<1x256xf32>
    %147 = arith.cmpf ogt, %145, %146 : vector<1x256xf32>
    %cst_85 = arith.constant 0.000000e+00 : f32
    %148 = vector.shape_cast %147 : vector<1x256xi1> to vector<1x256xi1>
    %149 = vector.broadcast %148 : vector<1x256xi1> to vector<16x256xi1>
    %150 = vector.broadcast %cst_85 : f32 to vector<16x256xf32>
    %151 = arith.select %149, %144, %150 : vector<16x256xi1>, vector<16x256xf32>
    %152 = arith.truncf %151 : vector<16x256xf32> to vector<16x256xbf16>
    %c96_86 = arith.constant 96 : index
    %c0_87 = arith.constant 0 : index
    %153 = vector.load %arg8[%c96_86, %c0_87] : memref<144x256xbf16, #tpu.memory_space<vmem>>, vector<16x256xbf16>
    tpu.vector_store %arg8[%c96_86, %c0_87], %152 {strides = array<i32>} : memref<144x256xbf16, #tpu.memory_space<vmem>>, vector<16x256xbf16>,
    %c240_i32_88 = arith.constant 240 : i32
    %154 = tpu.dynamic_rotate %91 by %c240_i32_88 dim 1 : vector<16x256xf32>, i32 -> vector<16x256xf32>
    %c7_89 = arith.constant 7 : index
    %c0_90 = arith.constant 0 : index
    %155 = vector.load %arg2[%c7_89, %c0_90] : memref<9x256xf32, #tpu.memory_space<vmem>>, vector<1x256xf32>
    %cst_91 = arith.constant 5.000000e-01 : f32
    %156 = vector.broadcast %cst_91 : f32 to vector<1x256xf32>
    %157 = arith.cmpf ogt, %155, %156 : vector<1x256xf32>
    %cst_92 = arith.constant 0.000000e+00 : f32
    %158 = vector.shape_cast %157 : vector<1x256xi1> to vector<1x256xi1>
    %159 = vector.broadcast %158 : vector<1x256xi1> to vector<16x256xi1>
    %160 = vector.broadcast %cst_92 : f32 to vector<16x256xf32>
    %161 = arith.select %159, %154, %160 : vector<16x256xi1>, vector<16x256xf32>
    %162 = arith.truncf %161 : vector<16x256xf32> to vector<16x256xbf16>
    %c112_93 = arith.constant 112 : index
    %c0_94 = arith.constant 0 : index
    %163 = vector.load %arg8[%c112_93, %c0_94] : memref<144x256xbf16, #tpu.memory_space<vmem>>, vector<16x256xbf16>
    tpu.vector_store %arg8[%c112_93, %c0_94], %162 {strides = array<i32>} : memref<144x256xbf16, #tpu.memory_space<vmem>>, vector<16x256xbf16>,
    %c239_i32_95 = arith.constant 239 : i32
    %164 = tpu.dynamic_rotate %91 by %c239_i32_95 dim 1 : vector<16x256xf32>, i32 -> vector<16x256xf32>
    %c8_96 = arith.constant 8 : index
    %c0_97 = arith.constant 0 : index
    %165 = vector.load %arg2[%c8_96, %c0_97] : memref<9x256xf32, #tpu.memory_space<vmem>>, vector<1x256xf32>
    %cst_98 = arith.constant 5.000000e-01 : f32
    %166 = vector.broadcast %cst_98 : f32 to vector<1x256xf32>
    %167 = arith.cmpf ogt, %165, %166 : vector<1x256xf32>
    %cst_99 = arith.constant 0.000000e+00 : f32
    %168 = vector.shape_cast %167 : vector<1x256xi1> to vector<1x256xi1>
    %169 = vector.broadcast %168 : vector<1x256xi1> to vector<16x256xi1>
    %170 = vector.broadcast %cst_99 : f32 to vector<16x256xf32>
    %171 = arith.select %169, %164, %170 : vector<16x256xi1>, vector<16x256xf32>
    %172 = arith.truncf %171 : vector<16x256xf32> to vector<16x256xbf16>
    %c128_100 = arith.constant 128 : index
    %c0_101 = arith.constant 0 : index
    %173 = vector.load %arg8[%c128_100, %c0_101] : memref<144x256xbf16, #tpu.memory_space<vmem>>, vector<16x256xbf16>
    tpu.vector_store %arg8[%c128_100, %c0_101], %172 {strides = array<i32>} : memref<144x256xbf16, #tpu.memory_space<vmem>>, vector<16x256xbf16>,
    %c0_102 = arith.constant 0 : index
    %c0_103 = arith.constant 0 : index
    %174 = vector.load %arg4[%c0_102, %c0_103] : memref<16x144xbf16, #tpu.memory_space<vmem>>, vector<16x144xbf16>
    %c0_104 = arith.constant 0 : index
    %c0_105 = arith.constant 0 : index
    %175 = vector.load %arg8[%c0_104, %c0_105] : memref<144x256xbf16, #tpu.memory_space<vmem>>, vector<144x256xbf16>
    %cst_106 = arith.constant dense<0.000000e+00> : vector<16x256xf32>
    %176 = tpu.matmul %174, %175, %cst_106 {dimension_numbers = #tpu.dot_dimension_numbers<[1], [0], [0], [1], [0, 0, 1, 1], [], []>} : vector<16x144xbf16>, vector<144x256xbf16>, vector<16x256xf32> -> vector<16x256xf32>
    %c0_107 = arith.constant 0 : index
    %c0_108 = arith.constant 0 : index
    %177 = vector.load %arg6[%c0_107, %c0_108] : memref<16x1xf32, #tpu.memory_space<vmem>>, vector<16x1xf32>
    %178 = vector.broadcast %177 : vector<16x1xf32> to vector<16x256xf32>
    %179 = arith.addf %176, %178 : vector<16x256xf32>
    %180 = arith.addf %179, %1 : vector<16x256xf32>
    %cst_109 = arith.constant 0.000000e+00 : f32
    %181 = vector.broadcast %cst_109 : f32 to vector<16x256xf32>
    %182 = arith.maximumf %180, %181 : vector<16x256xf32>
    %c0_110 = arith.constant 0 : index
    %c0_111 = arith.constant 0 : index
    %c0_112 = arith.constant 0 : index
    %183 = vector.load %arg7[%c0_110, %c0_111, %c0_112] : memref<1x16x256xf32, #tpu.memory_space<vmem>>, vector<1x16x256xf32>
    %184 = vector.shape_cast %183 : vector<1x16x256xf32> to vector<16x256xf32>
    %185 = vector.shape_cast %182 : vector<16x256xf32> to vector<1x16x256xf32>
    tpu.vector_store %arg7[%c0_110, %c0_111, %c0_112], %185 {strides = array<i32>} : memref<1x16x256xf32, #tpu.memory_space<vmem>>, vector<1x16x256xf32>,
    return
  }
  func.func @transform_0(%arg0: i32) -> (i32, i32, i32) {
    %c0_i32 = arith.constant 0 : i32
    %c0_i32_0 = arith.constant 0 : i32
    %c0_i32_1 = arith.constant 0 : i32
    return %arg0, %c0_i32, %c0_i32_0 : i32, i32, i32
  }
  func.func @transform_1(%arg0: i32) -> (i32, i32) {
    %c0_i32 = arith.constant 0 : i32
    %c0_i32_0 = arith.constant 0 : i32
    %c0_i32_1 = arith.constant 0 : i32
    return %c0_i32, %c0_i32_0 : i32, i32
  }
  func.func @transform_2(%arg0: i32) -> (i32, i32) {
    %c0_i32 = arith.constant 0 : i32
    %c0_i32_0 = arith.constant 0 : i32
    %c0_i32_1 = arith.constant 0 : i32
    return %c0_i32, %c0_i32_0 : i32, i32
  }
  func.func @transform_3(%arg0: i32) -> (i32, i32) {
    %c0_i32 = arith.constant 0 : i32
    %c0_i32_0 = arith.constant 0 : i32
    %c0_i32_1 = arith.constant 0 : i32
    return %c0_i32, %c0_i32_0 : i32, i32
  }
  func.func @transform_4(%arg0: i32) -> (i32, i32) {
    %c0_i32 = arith.constant 0 : i32
    %c0_i32_0 = arith.constant 0 : i32
    %c0_i32_1 = arith.constant 0 : i32
    return %c0_i32, %c0_i32_0 : i32, i32
  }
  func.func @transform_5(%arg0: i32) -> (i32, i32) {
    %c0_i32 = arith.constant 0 : i32
    %c0_i32_0 = arith.constant 0 : i32
    %c0_i32_1 = arith.constant 0 : i32
    return %c0_i32, %c0_i32_0 : i32, i32
  }
  func.func @transform_6(%arg0: i32) -> (i32, i32, i32) {
    %c0_i32 = arith.constant 0 : i32
    %c0_i32_0 = arith.constant 0 : i32
    %c0_i32_1 = arith.constant 0 : i32
    return %arg0, %c0_i32, %c0_i32_0 : i32, i32, i32
  }
}

</mosaic_0001>

<bundles_post_ra>
// kernel: tpu_custom_call.1
= control target key start
LH: loop header
LB: loop body
LE: loop exit
PB: predicated region body
PF: predicated region fallthrough
CT: control target
= control target key end

     0   :  { %11 = vsyncpa [#allocation4], 0  ;;  %s2516_s0 = inlined_call_operand.hbm [shape: f32[2,16,256], index: 0, kind: input, shape index: {}]   ;;  %s2517_s1 = inlined_call_operand.vmem [shape: f32[9,256], index: 1, kind: input, shape index: {}]   ;;  %s2518_s2 = inlined_call_operand.hbm [shape: bf16[16,144], index: 2, kind: input, shape index: {}]   ;;  %s2519_s3 = inlined_call_operand.hbm [shape: bf16[16,144], index: 3, kind: input, shape index: {}]   ;;  %s2520_s4 = inlined_call_operand.vmem [shape: f32[16,1], index: 4, kind: input, shape index: {}]   ;;  %s2521_s5 = inlined_call_operand.vmem [shape: f32[16,1], index: 5, kind: input, shape index: {}]   ;;  %s2522_s6 = inlined_call_operand.hbm [shape: f32[2,16,256], index: 6, kind: output, shape index: {}]  }
   0x1   :  { %13 = vsyncpa [#allocation4 + $0x1], 0 }
   0x2   :  { %14 = vsyncpa [#allocation7], 0 }
   0x3   :  { %15 = vsyncpa [#allocation5], 0 }
   0x4   :  { %17 = vsyncpa [#allocation5 + $0x1], 0  ;;  %s1751_s21 = smov 0   ;;  %s1753_s22 = smov 0  }
   0x5   :  { %s1755_s23 = smov 0   ;;  %s1757_s24 = smov 0  }
   0x6 LB: > { %s1772_s25 = sadd.s32 4294967295, %s1696_s24   ;;  %s1154_s26 = sadd.s32 4294967294, %s1696_s24   ;;  %s1696_s24 = sphi %s1757_s24, %s2612_s24   ;;  %s1692_s23 = sphi %s1755_s23, %s2611_s23   ;;  %s1688_s22 = sphi %s1753_s22, %s2610_s22   ;;  %s1684_s21 = sphi %s1751_s21, %s2609_s21  }
   0x7   : > { %p43_p0 = scmp.ne.s32.totalorder %s1688_s22, %s1684_s21  ;;  %p2523_p1 = scmp.eq.s32.totalorder %s1772_s25, 0 }
   0x8   : > { %p178_p3 = scmp.eq.s32.totalorder %s1154_s26, 1  ;;  %p1155_p5 = scmp.ge.s32.totalorder %s1696_s24, 1 }
   0x9   : > { %p1781_p4 = por %p2523_p1, %p43_p0  ;;  %p185_p7 = scmp.lt.s32.totalorder %s1696_s24, 3 }
   0xa   : > { %p1786_p6 = por %p178_p3, %p43_p0  ;;  %s1698_s30 = smov [#allocation6]  }
   0xb   : > { %s2534_s27 = scalar_select %p1781_p4, 1, 0 }
   0xc   : > { %s2535_s28 = scalar_select %p1786_p6, 1, 0 }
   0xd   : > { %p1791_p8 = pnand %p1155_p5, %p185_p7  ;;  %s200_s7 = sshll.u32 %s1698_s30, 4  ;;  %s1795_s7 = int_to_ptr.vmem [resolvable:$true] %s200_s7 }
   0xe   : > { %s1699_s9 = smov [#allocation8]   ;;  %s1540_s13 = scalar_lea.hbm %s2518_s2, 256 }
   0xf   : > { %p1302_p9 = pneg %p1791_p8  ;;  %s213_s10 = sshll.u32 %s1699_s9, 4  ;;  %s1806_s10 = int_to_ptr.vmem [resolvable:$true] %s213_s10 }
  0x10   : > { %p1541_p12 = scmp.ne.s32.totalorder %s2518_s2, %s1540_s13  ;;  %p1547_p5 = scmp.lt.u32.totalorder %s1540_s13, %s2518_s2 }
  0x11   : > { %p1802_p11 = pnand %p1302_p9, %p2523_p1 }
  0x13   : > { %p1542_p13 = pneg %p1802_p11 }
  0x15   : > { %p1543_p0 = pnand %p1542_p13, %p1541_p12 }
  0x17   : > { %p1544_p3 = pneg %p1543_p0 }
  0x19   : > { %p1549_p7 = pnand %p1547_p5, %p1544_p3 }
  0x1b   : > { %1552 = shalt.err (!%p1549_p7)
}
  0x1c   : > { %s1553_s18 = scalar_lea.vmem %s1795_s7, 256  ;;  %p1561_p2 = scmp.lt.s32.totalorder %s1795_s7, %s1795_s7 }
  0x1d   : > { %p1554_p9 = scmp.ne.s32.totalorder %s1795_s7, %s1553_s18  ;;  %p1562_p12 = scmp.lt.s32.totalorder %s1553_s18, %s1553_s18 }
  0x1f   : > { %p1556_p10 = pnand %p1554_p9, %p1542_p13  ;;  %p1563_p0 = por %p1562_p12, %p1561_p2 }
  0x21   : > { %p1557_p1 = pneg %p1556_p10 }
  0x23   : > { %p1564_p6 = pnand %p1563_p0, %p1557_p1 }
  0x25   : > { %1567 = shalt.err (!%p1564_p6)
}
  0x26   : > { %s1700_s19 = smov 128   ;;  %s1701_s20 = smov 8  }
  0x27   : > { %1305 = dma.hbm_to_vmem [thread:$0]  (!%p1802_p11), %s2518_s2, 256, %s1795_s7, [#allocation7], %s1700_s19, %s1700_s19, %s1701_s20  }
  0x28   : > { %s1568_s12 = scalar_lea.hbm %s2519_s3, 256 }
  0x29   : > { %p1569_p2 = scmp.ne.s32.totalorder %s2519_s3, %s1568_s12  ;;  %p1575_p10 = scmp.lt.u32.totalorder %s1568_s12, %s2519_s3 }
  0x2b   : > { %p1571_p1 = pnand %p1569_p2, %p1542_p13 }
  0x2d   : > { %p1572_p6 = pneg %p1571_p1 }
  0x2f   : > { %p1577_p3 = pnand %p1575_p10, %p1572_p6 }
  0x31   : > { %1580 = shalt.err (!%p1577_p3)
}
  0x32   : > { %s1581_s7 = scalar_lea.vmem %s1806_s10, 256  ;;  %p1589_p12 = scmp.lt.s32.totalorder %s1806_s10, %s1806_s10 }
  0x33   : > { %p1582_p5 = scmp.ne.s32.totalorder %s1806_s10, %s1581_s7  ;;  %p1590_p0 = scmp.lt.s32.totalorder %s1581_s7, %s1581_s7 }
  0x35   : > { %p1584_p7 = pnand %p1582_p5, %p1542_p13  ;;  %p1591_p2 = por %p1590_p0, %p1589_p12 }
  0x37   : > { %p1585_p9 = pneg %p1584_p7 }
  0x39   : > { %p1592_p1 = pnand %p1591_p2, %p1585_p9 }
  0x3b   : > { %1595 = shalt.err (!%p1592_p1)
}
  0x3c   : > { %1308 = dma.hbm_to_vmem [thread:$0]  (!%p1802_p11), %s2519_s3, 256, %s1806_s10, [#allocation7], %s1700_s19, %s1700_s19, %s1701_s20  }
  0x3d   : > { %s1861_s26 = sadd.s32 1, %s1696_s24   ;;  %s30_s8 = sadd.s32 1, %s1692_s23 }
  0x3e   : > { %s27_s30 = ssub.s32 %s1696_s24, %s1861_s26  ;;  %p37_p13 = scmp.ne.s32.totalorder %s1692_s23, %s1688_s22 }
  0x3f   : > { %p28_p6 = scmp.eq.s32.totalorder %s27_s30, 0  ;;  %p38_p10 = scmp.eq.s32.totalorder %s1696_s24, 0 }
  0x40   : > { %p2538_p3 = scmp.eq.s32.totalorder %s1772_s25, 1  ;;  %p1319_p7 = scmp.lt.s32.totalorder %s1696_s24, 2 }
  0x41   : > { %s1877_s11 = scalar_select %p28_p6, %s1692_s23, %s30_s8  }
  0x42   : > { %p1871_p5 = por %p2538_p3, %p37_p13  ;;  %p39_p9 = por %p38_p10, %p37_p13 }
  0x43   : > { %s233_s12 = sand.u32 1, %s1692_s23   ;;  %s1192_s10 = sshll.u32 %s1696_s24, 9 }
  0x44   : > { %s2539_s9 = scalar_select %p1871_p5, 1, 0 }
  0x45   : > { %s1159_s13 = sshll.u32 %s233_s12, 5  ;;  %s1884_s14 = scalar_lea.hbm %s2516_s0, %s1192_s10 }
  0x46   : > { %s237_s15 = scalar_lea.vmem [#allocation3], %s1159_s13  ;;  %p1888_p11 = pnand %p1319_p7, %p39_p9 }
  0x47   : > { %s244_s16 = sshll.u32 %s237_s15, 4  ;;  %s1892_s17 = scalar_lea.sflag [#allocation4], %s233_s12  ;;  %s1886_s16 = int_to_ptr.vmem [resolvable:$true] %s244_s16 }
  0x48   : > { %s1596_s18 = scalar_lea.hbm %s1884_s14, 512  ;;  %p1598_p0 = pneg %p1888_p11 }
  0x49   : > { %p1597_p12 = scmp.ne.s32.totalorder %s1884_s14, %s1596_s18  ;;  %s1601_s13 = scalar_lea.hbm %s2516_s0, 1024 }
  0x4a   : > { %p1602_p13 = scmp.lt.u32.totalorder %s1884_s14, %s2516_s0  ;;  %p1603_p6 = scmp.lt.u32.totalorder %s1601_s13, %s1596_s18 }
  0x4b   : > { %p1599_p2 = pnand %p1598_p0, %p1597_p12  ;;  %p1605_p3 = scmp.lt.u32.totalorder %s1596_s18, %s1884_s14 }
  0x4c   : > { %p1604_p10 = por %p1603_p6, %p1602_p13 }
  0x4d   : > { %p1600_p1 = pneg %p1599_p2 }
  0x4e   : > { %p1606_p7 = por %p1605_p3, %p1604_p10 }
  0x50   : > { %p1607_p9 = pnand %p1606_p7, %p1600_p1 }
  0x52   : > { %1610 = shalt.err (!%p1607_p9)
}
  0x53   : > { %s1611_s12 = scalar_lea.vmem %s1886_s16, 512  ;;  %s1702_s20 = smov [#allocation3]  }
  0x54   : > { %p1612_p12 = scmp.ne.s32.totalorder %s1886_s16, %s1611_s12  ;;  %s1616_s15 = sshll.u32 %s1702_s20, 4  ;;  %s1617_s15 = int_to_ptr.vmem [resolvable:$false] %s1616_s15 }
  0x55   : > { %s1618_s8 = scalar_lea.vmem %s1617_s15, 1024  ;;  %p1619_p4 = scmp.lt.s32.totalorder %s1886_s16, %s1617_s15 }
  0x56   : > { %p1614_p2 = pnand %p1612_p12, %p1598_p0  ;;  %p1620_p13 = scmp.lt.s32.totalorder %s1618_s8, %s1611_s12 }
  0x58   : > { %p1615_p5 = pneg %p1614_p2  ;;  %p1621_p6 = por %p1620_p13, %p1619_p4 }
  0x5a   : > { %p1622_p10 = pnand %p1621_p6, %p1615_p5 }
  0x5c   : > { %1625 = shalt.err (!%p1622_p10)
}
  0x5d   : > { %s1703_s18 = smov 256   ;;  %s1704_s30 = smov 16  }
  0x5e   : > { %1312 = dma.hbm_to_vmem [thread:$0]  (!%p1888_p11), %s1884_s14, 512, %s1886_s16, %s1892_s17, %s1703_s18, %s1703_s18, %s1704_s30  }
  0x5f   : > { %256 = sbr.rel (%p1791_p8) target bundleno = 882 (0x372), region = 44  ;;  %s1923_s13 = sand.u32 (!%p1791_p8), 1, %s1688_s22  }
  0x60   : > { %s2526_s10 = sshll.u32 (!%p1791_p8), %s1923_s13, 5  ;;  %s259_s19 = scalar_lea.sflag (!%p1791_p8), [#allocation4], %s1923_s13 }
  0x61   : > { %s1929_s12 = scalar_lea.vmem (!%p1791_p8), [#allocation3], %s2526_s10  ;;  %p2541_p4 = scmp.ne.s32.totalorder (!%p1791_p8), %s2534_s27, 0 }
  0x66   : > { %1671 = dma.done.wait (%p2541_p4), %s259_s19, 512  }
  0x67   : > { %1673 = vsyncadd (%p2541_p4), %s259_s19, 4294966784  ;;  %p2542_p5 = scmp.eq.s32.totalorder %s1772_s25, 0 }
  0x69   : > { %1675 = dma.done.wait (%p2542_p5), [#allocation7], 512   ;;  %p2543_p8 = pmov %p2542_p5 }
  0x6a   : > { %v1705_v0 = vmov 0   ;;  %v1942_v1 = vld [vmem:[%s1929_s12] sm:$0xff]  ;;  %v1945_v2 = vld [vmem:[%s1929_s12 + $0x10] sm:$0xff]  ;;  %v1948_v3 = vld [vmem:[%s1929_s12 + $0x8] sm:$0xff]  ;;  %s1706_s27 = smov 16   ;;  %s1707_s29 = smov 17   ;;  %v312_v10 = vlaneseq }
  0x6b   : > { %1677 = vsyncadd (%p2543_p8), [#allocation7], 4294966784  ;;  %1451 = vset.pattern.permute.xlu0 %v1705_v0  ;;  %1452 = vset.pattern.permute.xlu1 %v1705_v0  ;;  %v1381_v4 = vpack.i.bf16 %v1945_v2, %v1942_v1  ;;  %v1953_v5 = vld [vmem:[%s1929_s12 + $0x18] sm:$0xff]  ;;  %s1708_s14 = smov 15   ;;  %s1709_s16 = smov 1   ;;  %vm630_vm0 = vcmask 130048  }
  0x6c   : > { %v1386_v6 = vpack.i.bf16 %v1953_v5, %v1948_v3  ;;  %s1710_s7 = smov 127   ;;  %s2531_s17 = smov 113   ;;  %v1535_v7 = vld [vmem:[#allocation6 + $0x4] ss:$8 sps:$4 sm:$0xff]   ;;  %v323_v12 = vshrl.u32 %v312_v10, 7  ;;  %v1991_v17 = vand.u32 127, %v312_v10 }
  0x6d   : > { %1382 = vrot.lane.b32.xlu1 %v1381_v4, %s1706_s27  ;;  %1372 = vrot.lane.b32.xlu0 %v1381_v4, %s1707_s29  ;;  %s2527_s20 = smov 112   ;;  %s2529_s15 = smov 111   ;;  %v609_v8 = vld [vmem:[%s2520_s4] sm:$0xff]  ;;  %v610_v9 = vld [vmem:[%s2520_s4 + $0x8] sm:$0xff] }
  0x6e   : > { %1176 = vmatprep.mubr.msk.bf16.mxu0 %vm630_vm0, %v1535_v7  ;;  %v319_v11 = vld [vmem:[%s2517_s1] ss:$8 sm:$0x3]  ;;  %v1167_v13 = vld [vmem:[%s2517_s1 + $0x1] ss:$8 sm:$0x3] }
  0x6f   : > { %vm320_vm1 = vcmp.gt.f32.partialorder %v319_v11, 0.5  ;;  %v1986_v14 = vsub.s32 0, %v323_v12  ;;  %v1988_v15 = vsub.s32 1, %v323_v12  ;;  %vm355_vm2 = vcmp.gt.f32.partialorder %v1167_v13, 0.5  ;;  %p2606_p0 = scmp.ne.s32.totalorder %s2539_s9, 0  ;;  %s1714_s30 = smov [#allocation9]  }
  0x70   : > { %v321_v16 = vsel %vm320_vm1, 1, %v1705_v0  ;;  %v1168_v18 = vld [vmem:[%s2517_s1 + $0x2] ss:$8 sm:$0x3]  ;;  %v356_v22 = vsel %vm355_vm2, 1, %v1705_v0  ;;  %vm348_vm5 = vcmp.lt.s32.totalorder %v1991_v17, 16 }
  0x71   : > { %1387 = vrot.lane.b32.xlu1 %v1386_v6, %s1706_s27  ;;  %1377 = vrot.lane.b32.xlu0 %v1386_v6, %s1707_s29  ;;  %v1169_v19 = vld [vmem:[%s2517_s1 + $0x3] ss:$8 sm:$0x3]  ;;  %v329_v20 = vrot.slane %v321_v16, %v1988_v15  ;;  %v325_v21 = vrot.slane %v321_v16, %v1986_v14  ;;  %vm390_vm3 = vcmp.gt.f32.partialorder %v1168_v18, 0.5  ;;  %v364_v25 = vrot.slane %v356_v22, %v1988_v15  ;;  %s1630_s19 = sshll.u32 %s1714_s30, 4  ;;  %s1631_s19 = int_to_ptr.vmem [resolvable:$false] %s1630_s19 }
  0x72   : > { %vm425_vm4 = vcmp.gt.f32.partialorder %v1169_v19, 0.5  ;;  %v360_v26 = vrot.slane %v356_v22, %v1986_v14  ;;  %vm314_vm6 = vcmp.lt.s32.totalorder %v1991_v17, 17  ;;  %vm383_vm9 = vcmp.lt.s32.totalorder %v1991_v17, 15  ;;  %v1170_v57 = vld [vmem:[%s2517_s1 + $0x5] ss:$8 sm:$0x3] }
  0x73   : > { %vm2006_vm7 = vcmp.eq.s32.totalorder %v329_v20, 1  ;;  %vm2010_vm8 = vcmp.eq.s32.totalorder %v325_v21, 1  ;;  %v391_v33 = vsel %vm390_vm3, 1, %v1705_v0  ;;  %v2017_v34 = vsel %vm425_vm4, 1, %v1705_v0  ;;  %s1632_s8 = scalar_lea.vmem %s1631_s19, 1024 }
  0x74   : > { %vm418_vm10 = vcmp.lt.s32.totalorder %v1991_v17, 1  ;;  %vm2020_vm11 = vcmp.eq.s32.totalorder %v364_v25, 1  ;;  %vm2024_vm12 = vcmp.eq.s32.totalorder %v360_v26, 1  ;;  %v399_v43 = vrot.slane %v391_v33, %v1988_v15  ;;  %vm1194_vm13 = vmpackc.low %vm2006_vm7, %vm2006_vm7  ;;  %v1171_v12 = vld [vmem:[%s2517_s1 + $0x6] ss:$8 sm:$0x3] }
  0x75   : > { %1397 = vrot.lane.b32.xlu1 %v1386_v6, %s1708_s14  ;;  %1392 = vrot.lane.b32.xlu0 %v1381_v4, %s1708_s14  ;;  %v395_v44 = vrot.slane %v391_v33, %v1986_v14  ;;  %v434_v45 = vrot.slane %v2017_v34, %v1988_v15  ;;  %v430_v46 = vrot.slane %v2017_v34, %v1986_v14  ;;  %vm1197_vm14 = vmpackc.low %vm2010_vm8, %vm2010_vm8  ;;  %vm464_vm2 = vcmp.gt.f32.partialorder %v1170_v57, 0.5 }
  0x76   : > { %vm1200_vm15 = vmpackc.low %vm2020_vm11, %vm2020_vm11  ;;  %vm2067_vm1 = vcmp.eq.s32.totalorder %v399_v43, 1  ;;  %v465_v25 = vsel %vm464_vm2, 1, %v1705_v0  ;;  %vm499_vm11 = vcmp.gt.f32.partialorder %v1171_v12, 0.5  ;;  %v446_v43 = vpack.c.bf16 %v1953_v5, %v1948_v3 }
  0x77   : > { %vm1203_vm3 = vmpackc.low %vm2024_vm12, %vm2024_vm12  ;;  %vm2093_vm7 = vcmp.eq.s32.totalorder %v395_v44, 1  ;;  %vm2097_vm8 = vcmp.eq.s32.totalorder %v434_v45, 1  ;;  %v469_v41 = vrot.slane %v465_v25, %v1986_v14  ;;  %v445_v44 = vpack.c.bf16 %v1945_v2, %v1942_v1  ;;  %v1173_v2 = vld [vmem:[%s2517_s1 + $0x10] ss:$8 sm:$0x3] }
  0x78   : > { %vm1206_vm4 = vmpackc.low %vm2067_vm1, %vm2067_vm1  ;;  %vm492_vm2 = vcmp.lt.s32.totalorder %v1991_v17, 113 }
  0x79   : > { %1407 = vrot.lane.b32.xlu1 %v1386_v6, %s1709_s16  ;;  %1402 = vrot.lane.b32.xlu0 %v1381_v4, %s1709_s16  ;;  %vm1209_vm12 = vmpackc.low %vm2093_vm7, %vm2093_vm7  ;;  %vm2147_vm7 = vcmp.eq.s32.totalorder %v469_v41, 1 }
  0x7d   : > { %1417 = vrot.lane.b32.xlu1 %v1386_v6, %s1710_s7  ;;  %1412 = vrot.lane.b32.xlu0 %v1381_v4, %s1710_s7 }
  0x81   : > { %1427 = vrot.lane.b32.xlu1 %v1386_v6, %s2531_s17  ;;  %1422 = vrot.lane.b32.xlu0 %v1381_v4, %s2531_s17  ;;  %s2571_s17 = smov 112  }
  0x85   : > { %1437 = vrot.lane.b32.xlu1 %v1386_v6, %s2527_s20  ;;  %1432 = vrot.lane.b32.xlu0 %v1381_v4, %s2527_s20  ;;  %s2605_s20 = sshll.u32 %s1923_s13, 5 }
  0x89   : > { %1447 = vrot.lane.b32.xlu1 %v1386_v6, %s2529_s15  ;;  %1442 = vrot.lane.b32.xlu0 %v1381_v4, %s2529_s15  ;;  %s2572_s15 = smov 111  }
  0x8d   : > { %613 = vperm.xlu0 %1451, %v609_v8   ;;  %618 = vperm.xlu1 %1452, %v610_v9  }
  0xdf   : > { %v1383_v23 = vpop.permute.xlu1 %1382  ;;  %v1373_v24 = vpop.permute.xlu0 %1372 }
  0xe0   : > { %v1385_v29 = vunpack.i.h.bf16 %v1383_v23  ;;  %v1384_v30 = vunpack.i.l.bf16 %v1383_v23  ;;  %v1375_v39 = vunpack.i.h.bf16 %v1373_v24  ;;  %v1374_v40 = vunpack.i.l.bf16 %v1373_v24 }
  0xe3   : > { %v1388_v31 = vpop.permute.xlu1 %1387  ;;  %v1378_v32 = vpop.permute.xlu0 %1377 }
  0xe4   : > { %v1390_v35 = vunpack.i.h.bf16 %v1388_v31  ;;  %v1389_v36 = vunpack.i.l.bf16 %v1388_v31  ;;  %v1380_v37 = vunpack.i.h.bf16 %v1378_v32  ;;  %v1379_v38 = vunpack.i.l.bf16 %v1378_v32 }
  0xe6   : > { %v349_v47 = vsel %vm348_vm5, %v1384_v30, %v1389_v36  ;;  %v350_v48 = vsel %vm348_vm5, %v1385_v29, %v1390_v35  ;;  %v315_v49 = vsel %vm314_vm6, %v1374_v40, %v1379_v38  ;;  %v316_v50 = vsel %vm314_vm6, %v1375_v39, %v1380_v37 }
  0xe7   : > { %v1398_v51 = vpop.permute.xlu1 %1397  ;;  %v1393_v52 = vpop.permute.xlu0 %1392  ;;  %v1195_v53 = vpack.c.bf16 %v316_v50, %v315_v49  ;;  %v317_v54 = vsel %vm314_vm6, %v1379_v38, %v1374_v40  ;;  %v318_v55 = vsel %vm314_vm6, %v1380_v37, %v1375_v39  ;;  %v351_v62 = vsel %vm348_vm5, %v1389_v36, %v1384_v30  ;;  %v1172_v39 = vld [vmem:[%s2517_s1 + $0x7] ss:$8 sm:$0x3] }
  0xe8   : > { %v1400_v56 = vunpack.i.h.bf16 %v1398_v51  ;;  %v1198_v58 = vpack.c.bf16 %v318_v55, %v317_v54  ;;  %v1399_v59 = vunpack.i.l.bf16 %v1398_v51  ;;  %v1395_v60 = vunpack.i.h.bf16 %v1393_v52 }
  0xe9   : > { %v1394_v61 = vunpack.i.l.bf16 %v1393_v52  ;;  %v352_v63 = vsel %vm348_vm5, %v1390_v35, %v1385_v29  ;;  %v1201_v4 = vpack.c.bf16 %v350_v48, %v349_v47  ;;  %1196 = vmatprep.subr.msk.bf16.mxu0 %vm1194_vm13, %v1195_v53  ;;  %vm1212_vm13 = vmpackc.low %vm2097_vm8, %vm2097_vm8  ;;  %v473_v40 = vrot.slane %v465_v25, %v1988_v15 }
  0xea   : > { %1199 = vmatpush1.bf16.msk.msra.mxu0 %vm1197_vm14, %v1198_v58  ;;  %v385_v7 = vsel %vm383_vm9, %v1395_v60, %v1400_v56  ;;  %v387_v8 = vsel %vm383_vm9, %v1400_v56, %v1395_v60  ;;  %v1204_v20 = vpack.c.bf16 %v352_v63, %v351_v62  ;;  %vm2116_vm14 = vcmp.eq.s32.totalorder %v430_v46, 1 }
  0xeb   : > { %v384_v9 = vsel %vm383_vm9, %v1394_v61, %v1399_v59  ;;  %v1408_v10 = vpop.permute.xlu1 %1407  ;;  %v1403_v11 = vpop.permute.xlu0 %1402  ;;  %v386_v13 = vsel %vm383_vm9, %v1399_v59, %v1394_v61  ;;  %1202 = vmatprep.subr.msk.bf16.mxu0 %vm1200_vm15, %v1201_v4  ;;  %vm457_vm15 = vcmp.lt.s32.totalorder %v1991_v17, 127  ;;  %v500_v47 = vsel %vm499_vm11, 1, %v1705_v0  ;;  %vm1215_vm1 = vmpackc.low %vm2116_vm14, %vm2116_vm14 }
  0xec   : > { %v1207_v16 = vpack.c.bf16 %v385_v7, %v384_v9  ;;  %v1410_v18 = vunpack.i.h.bf16 %v1408_v10  ;;  %v1409_v19 = vunpack.i.l.bf16 %v1408_v10  ;;  %v1405_v21 = vunpack.i.h.bf16 %v1403_v11 }
  0xed   : > { %v1404_v22 = vunpack.i.l.bf16 %v1403_v11  ;;  %v1210_v26 = vpack.c.bf16 %v387_v8, %v386_v13  ;;  %v508_v56 = vrot.slane %v500_v47, %v1988_v15  ;;  %v504_v57 = vrot.slane %v500_v47, %v1986_v14 }
  0xee   : > { %1205 = vmatpush1.bf16.msk.msra.mxu0 %vm1203_vm3, %v1204_v20  ;;  %v420_v27 = vsel %vm418_vm10, %v1405_v21, %v1410_v18  ;;  %v422_v28 = vsel %vm418_vm10, %v1410_v18, %v1405_v21  ;;  %vm534_vm3 = vcmp.gt.f32.partialorder %v1172_v39, 0.5  ;;  %vm2533_vm8 = vcmp.lt.s32.totalorder %v1991_v17, 112 }
  0xef   : > { %v419_v29 = vsel %vm418_vm10, %v1404_v22, %v1409_v19  ;;  %v1418_v30 = vpop.permute.xlu1 %1417  ;;  %v1413_v31 = vpop.permute.xlu0 %1412  ;;  %v421_v32 = vsel %vm418_vm10, %v1409_v19, %v1404_v22  ;;  %1208 = vmatprep.subr.msk.bf16.mxu0 %vm1206_vm4, %v1207_v16  ;;  %vm2143_vm4 = vcmp.eq.s32.totalorder %v473_v40, 1  ;;  %v535_v61 = vsel %vm534_vm3, 1, %v1705_v0 }
  0xf0   : > { %v1213_v33 = vpack.c.bf16 %v420_v27, %v419_v29  ;;  %v1420_v34 = vunpack.i.h.bf16 %v1418_v30  ;;  %v1419_v35 = vunpack.i.l.bf16 %v1418_v30  ;;  %v1415_v37 = vunpack.i.h.bf16 %v1413_v31 }
  0xf1   : > { %v1414_v38 = vunpack.i.l.bf16 %v1413_v31  ;;  %v1216_v42 = vpack.c.bf16 %v422_v28, %v421_v32  ;;  %vm569_vm11 = vcmp.gt.f32.partialorder %v1173_v2, 0.5  ;;  %vm2170_vm14 = vcmp.eq.s32.totalorder %v504_v57, 1 }
  0xf2   : > { %1211 = vmatpush1.bf16.msk.msra.mxu0 %vm1209_vm12, %v1210_v26  ;;  %v461_v48 = vsel %vm457_vm15, %v1420_v34, %v1415_v37  ;;  %v459_v58 = vsel %vm457_vm15, %v1415_v37, %v1420_v34  ;;  %vm1218_vm12 = vmpackc.low %vm2143_vm4, %vm2143_vm4  ;;  %v543_v13 = vrot.slane %v535_v61, %v1988_v15  ;;  %v539_v21 = vrot.slane %v535_v61, %v1986_v14 }
  0xf3   : > { %v1428_v45 = vpop.permute.xlu1 %1427  ;;  %v1423_v46 = vpop.permute.xlu0 %1422  ;;  %1214 = vmatprep.subr.msk.bf16.mxu0 %vm1212_vm13, %v1213_v33  ;;  %v460_v49 = vsel %vm457_vm15, %v1419_v35, %v1414_v38  ;;  %v458_v62 = vsel %vm457_vm15, %v1414_v38, %v1419_v35  ;;  %vm2166_vm13 = vcmp.eq.s32.totalorder %v508_v56, 1  ;;  %v570_v22 = vsel %vm569_vm11, 1, %v1705_v0 }
  0xf4   : > { %v1430_v50 = vunpack.i.h.bf16 %v1428_v45  ;;  %v1429_v51 = vunpack.i.l.bf16 %v1428_v45  ;;  %v1425_v52 = vunpack.i.h.bf16 %v1423_v46  ;;  %v1424_v53 = vunpack.i.l.bf16 %v1423_v46  ;;  %vm1224_vm3 = vmpackc.low %vm2166_vm13, %vm2166_vm13  ;;  %v1533_v45 = vld [vmem:[#allocation6] ss:$8 sps:$4 sm:$0xff]  }
  0xf5   : > { %v1219_v63 = vpack.c.bf16 %v461_v48, %v460_v49  ;;  %v1222_v16 = vpack.c.bf16 %v459_v58, %v458_v62  ;;  %vm562_vm4 = vcmp.lt.s32.totalorder %v1991_v17, 111  ;;  %vm2193_vm11 = vcmp.eq.s32.totalorder %v543_v13, 1  ;;  %v1179_v13 = vld [vmem:[%s2517_s1 + $0x3] ss:$8 sm:$0x3] }
  0xf6   : > { %1217 = vmatpush1.bf16.msk.msra.mxu0 %vm1215_vm1, %v1216_v42  ;;  %v496_v7 = vsel %vm492_vm2, %v1430_v50, %v1425_v52  ;;  %v495_v8 = vsel %vm492_vm2, %v1429_v51, %v1424_v53  ;;  %v494_v18 = vsel %vm492_vm2, %v1425_v52, %v1430_v50  ;;  %v493_v23 = vsel %vm492_vm2, %v1424_v53, %v1429_v51  ;;  %vm1221_vm1 = vmpackc.low %vm2147_vm7, %vm2147_vm7 }
  0xf7   : > { %v1438_v59 = vpop.permute.xlu1 %1437  ;;  %v1433_v60 = vpop.permute.xlu0 %1432  ;;  %642 = vmatprep.subr.bf16.mxu0 %v446_v43  ;;  %v1225_v24 = vpack.c.bf16 %v496_v7, %v495_v8  ;;  %v578_v32 = vrot.slane %v570_v22, %v1988_v15  ;;  %v1228_v33 = vpack.c.bf16 %v494_v18, %v493_v23  ;;  %vm1227_vm7 = vmpackc.low %vm2170_vm14, %vm2170_vm14  ;;  %vm544_vm13 = vcmp.eq.s32.totalorder %v539_v21, 1  ;;  %v693_v7 = vld [vmem:[%s2517_s1] ss:$8 sm:$0x3] }
  0xf8   : > { %v1440_v4 = vunpack.i.h.bf16 %v1438_v59  ;;  %v1439_v6 = vunpack.i.l.bf16 %v1438_v59  ;;  %v1435_v9 = vunpack.i.h.bf16 %v1433_v60  ;;  %v1434_v10 = vunpack.i.l.bf16 %v1433_v60  ;;  %vm1233_vm14 = vmpackc.low %vm544_vm13, %vm544_vm13  ;;  %v1177_v8 = vld [vmem:[%s2517_s1 + $0x1] ss:$8 sm:$0x3] }
  0xf9   : > { %v574_v39 = vrot.slane %v570_v22, %v1986_v14 }
  0xfa   : > { %643 = vmatpush1.bf16.msra.mxu0 %v445_v44  ;;  %v531_v25 = vsel %vm2533_vm8, %v1440_v4, %v1435_v9  ;;  %v530_v26 = vsel %vm2533_vm8, %v1439_v6, %v1434_v10  ;;  %v529_v34 = vsel %vm2533_vm8, %v1435_v9, %v1440_v4  ;;  %v528_v35 = vsel %vm2533_vm8, %v1434_v10, %v1439_v6  ;;  %v969_v4 = vld [vmem:[%s2521_s5] sm:$0xff]  ;;  %v970_v6 = vld [vmem:[%s2521_s5 + $0x8] sm:$0xff] }
  0xfb   : > { %v1448_v19 = vpop.permute.xlu1 %1447  ;;  %v1443_v20 = vpop.permute.xlu0 %1442  ;;  %1220 = vmatprep.subr.msk.bf16.mxu0 %vm1218_vm12, %v1219_v63  ;;  %v1231_v36 = vpack.c.bf16 %v531_v25, %v530_v26  ;;  %vm1230_vm12 = vmpackc.low %vm2193_vm11, %vm2193_vm11  ;;  %v1234_v40 = vpack.c.bf16 %v529_v34, %v528_v35  ;;  %vm579_vm8 = vcmp.eq.s32.totalorder %v574_v39, 1  ;;  %v1538_v63 = vld [vmem:[#allocation8 + $0x4] ss:$8 sps:$4 sm:$0xff]   ;;  %v1178_v10 = vld [vmem:[%s2517_s1 + $0x2] ss:$8 sm:$0x3] }
  0xfc   : > { %v1450_v27 = vunpack.i.h.bf16 %v1448_v19  ;;  %v1449_v28 = vunpack.i.l.bf16 %v1448_v19  ;;  %v1445_v29 = vunpack.i.h.bf16 %v1443_v20  ;;  %v1444_v30 = vunpack.i.l.bf16 %v1443_v20  ;;  %vm1239_vm11 = vmpackc.low %vm579_vm8, %vm579_vm8  ;;  %1186 = vmatprep.mubr.msk.bf16.mxu1 %vm630_vm0, %v1538_v63 }
  0xfd   : > { %vm694_vm0 = vcmp.gt.f32.partialorder %v693_v7, 0.5  ;;  %vm727_vm8 = vcmp.gt.f32.partialorder %v1177_v8, 0.5 }
  0xfe   : > { %1223 = vmatpush1.bf16.msk.msra.mxu0 %vm1221_vm1, %v1222_v16  ;;  %v566_v37 = vsel %vm562_vm4, %v1450_v27, %v1445_v29  ;;  %v565_v38 = vsel %vm562_vm4, %v1449_v28, %v1444_v30  ;;  %vm580_vm1 = vcmp.eq.s32.totalorder %v578_v32, 1  ;;  %v564_v41 = vsel %vm562_vm4, %v1445_v29, %v1450_v27 }
  0xff   : > { %1226 = vmatprep.subr.msk.bf16.mxu0 %vm1224_vm3, %v1225_v24  ;;  %v563_v42 = vsel %vm562_vm4, %v1444_v30, %v1449_v28  ;;  %v1237_v43 = vpack.c.bf16 %v566_v37, %v565_v38  ;;  %vm1236_vm3 = vmpackc.low %vm580_vm1, %vm580_vm1  ;;  %v695_v9 = vsel %vm694_vm0, 1, %v1705_v0  ;;  %v728_v11 = vsel %vm727_vm8, 1, %v1705_v0  ;;  %v1180_v37 = vld [vmem:[%s2517_s1 + $0x5] ss:$8 sm:$0x3] }
 0x100   : > { %v1240_v44 = vpack.c.bf16 %v564_v41, %v563_v42  ;;  %v703_v12 = vrot.slane %v695_v9, %v1988_v15  ;;  %v699_v16 = vrot.slane %v695_v9, %v1986_v14  ;;  %v736_v18 = vrot.slane %v728_v11, %v1988_v15 }
 0x101   : > { %v732_v28 = vrot.slane %v728_v11, %v1986_v14  ;;  %vm830_vm8 = vcmp.gt.f32.partialorder %v1180_v37, 0.5 }
 0x102   : > { %1229 = vmatpush1.bf16.msk.msra.mxu0 %vm1227_vm7, %v1228_v33  ;;  %vm760_vm7 = vcmp.gt.f32.partialorder %v1178_v10, 0.5  ;;  %vm2262_vm13 = vcmp.eq.s32.totalorder %v703_v12, 1  ;;  %vm2266_vm1 = vcmp.eq.s32.totalorder %v699_v16, 1  ;;  %v831_v7 = vsel %vm830_vm8, 1, %v1705_v0 }
 0x103   : > { %1232 = vmatprep.subr.msk.bf16.mxu0 %vm1230_vm12, %v1231_v36  ;;  %v761_v20 = vsel %vm760_vm7, 1, %v1705_v0  ;;  %vm793_vm12 = vcmp.gt.f32.partialorder %v1179_v13, 0.5  ;;  %vm2294_vm0 = vcmp.eq.s32.totalorder %v732_v28, 1  ;;  %v1182_v13 = vld [vmem:[%s2517_s1 + $0x7] ss:$8 sm:$0x3] }
 0x104   : > { %v769_v30 = vrot.slane %v761_v20, %v1988_v15  ;;  %v794_v31 = vsel %vm793_vm12, 1, %v1705_v0  ;;  %vm1251_vm12 = vmpackc.low %vm2294_vm0, %vm2294_vm0 }
 0x106   : > { %1235 = vmatpush1.bf16.msk.msra.mxu0 %vm1233_vm14, %v1234_v40  ;;  %vm2271_vm14 = vcmp.eq.s32.totalorder %v736_v18, 1 }
 0x107   : > { %1238 = vmatprep.subr.msk.bf16.mxu0 %vm1236_vm3, %v1237_v43  ;;  %vm1242_vm3 = vmpackc.low %vm2262_vm13, %vm2262_vm13 }
 0x108   : > { %vm1248_vm7 = vmpackc.low %vm2271_vm14, %vm2271_vm14 }
 0x10a   : > { %1241 = vmatpush1.bf16.msk.msra.mxu0 %vm1239_vm11, %v1240_v44  ;;  %vm1245_vm11 = vmpackc.low %vm2266_vm1, %vm2266_vm1 }
 0x10c   : > { %v614_v46 = vpop.permute.xlu0 %613  ;;  %v619_v48 = vpop.permute.xlu1 %618 }
 0x10d   : > { %667 = vmatmul.mubr.bf16.vlgmr.msra.gmra.mrb[0].mxu0 %v1533_v45 }
 0x1e0   : > { %v668_v47 = vpop.f32.mrb[0].mxu0 }
 0x1e1   : > { %v669_v49 = vadd.f32 %v668_v47, %v614_v46  ;;  %v670_v2 = vpop.f32.mrb[1].mxu0 }
 0x1e2   : > { %v671_v50 = vadd.f32 %v670_v2, %v614_v46  ;;  %v672_v51 = vpop.f32.mrb[2].mxu0  ;;  %v765_v46 = vrot.slane %v761_v20, %v1986_v14 }
 0x1e3   : > { %v673_v52 = vadd.f32 %v672_v51, %v619_v48  ;;  %v674_v53 = vpop.f32.mrb[3].mxu0  ;;  %v677_v55 = vmax.f32 %v669_v49, 0.0 }
 0x1e4   : > { %v675_v54 = vadd.f32 %v674_v53, %v619_v48  ;;  %v678_v57 = vmax.f32 %v671_v50, 0.0  ;;  %v802_v48 = vrot.slane %v794_v31, %v1988_v15  ;;  %v1181_v53 = vld [vmem:[%s2517_s1 + $0x6] ss:$8 sm:$0x3] }
 0x1e5   : > { %v679_v56 = vmax.f32 %v673_v52, 0.0  ;;  %vm863_vm1 = vcmp.gt.f32.partialorder %v1181_v53, 0.5 }
 0x1e6   : > { %v680_v58 = vmax.f32 %v675_v54, 0.0  ;;  %vm2326_vm13 = vcmp.eq.s32.totalorder %v802_v48, 1 }
 0x1e7   : > { %v1453_v59 = vpack.i.bf16 %v679_v56, %v677_v55  ;;  %v2221_v62 = vpack.c.bf16 %v679_v56, %v677_v55  ;;  %vm1260_vm0 = vmpackc.low %vm2326_vm13, %vm2326_vm13 }
 0x1e8   : > { %v1473_v60 = vpack.i.bf16 %v680_v58, %v678_v57  ;;  %v2219_v61 = vpack.c.bf16 %v680_v58, %v678_v57 }
 0x1e9   : > { %1454 = vrot.lane.b32.xlu1 %v1453_v59, %s1707_s29 }
 0x1ea   : > { %1474 = vrot.lane.b32.xlu0 %v1473_v60, %s1707_s29  ;;  %s2570_s29 = smov 113  }
 0x1ed   : > { %1459 = vrot.lane.b32.xlu1 %v1453_v59, %s1706_s27 }
 0x1ee   : > { %1479 = vrot.lane.b32.xlu0 %v1473_v60, %s1706_s27 }
 0x1f1   : > { %1464 = vrot.lane.b32.xlu1 %v1453_v59, %s1708_s14 }
 0x1f2   : > { %1484 = vrot.lane.b32.xlu0 %v1473_v60, %s1708_s14 }
 0x1f5   : > { %1469 = vrot.lane.b32.xlu1 %v1453_v59, %s1709_s16 }
 0x1f6   : > { %1489 = vrot.lane.b32.xlu0 %v1473_v60, %s1709_s16 }
 0x1f9   : > { %1494 = vrot.lane.b32.xlu1 %v1453_v59, %s1710_s7 }
 0x1fa   : > { %1514 = vrot.lane.b32.xlu0 %v1473_v60, %s1710_s7 }
 0x1fd   : > { %1499 = vrot.lane.b32.xlu1 %v1453_v59, %s2570_s29 }
 0x1fe   : > { %1519 = vrot.lane.b32.xlu0 %v1473_v60, %s2570_s29  ;;  %s298_s29 = scalar_lea.vmem [#allocation9], %s2605_s20 }
 0x201   : > { %1504 = vrot.lane.b32.xlu1 %v1453_v59, %s2571_s17 }
 0x202   : > { %1524 = vrot.lane.b32.xlu0 %v1473_v60, %s2571_s17  ;;  %s1062_s17 = sshll.u32 %s298_s29, 4  ;;  %s2466_s17 = int_to_ptr.vmem [resolvable:$true] %s1062_s17 }
 0x203   : > { %p1633_p7 = scmp.lt.s32.totalorder %s2466_s17, %s1631_s19 }
 0x205   : > { %1509 = vrot.lane.b32.xlu1 %v1453_v59, %s2572_s15 }
 0x206   : > { %1529 = vrot.lane.b32.xlu0 %v1473_v60, %s2572_s15  ;;  %s1193_s15 = sshll.u32 %s1772_s25, 9  ;;  %s1049_s25 = scalar_lea.sflag [#allocation5], %s1923_s13 }
 0x207   : > { %s2471_s7 = scalar_lea.hbm %s2522_s6, %s1193_s15 }
 0x209   : > { %973 = vperm.xlu1 %1452, %v969_v4   ;;  %v798_v4 = vrot.slane %v794_v31, %v1986_v14 }
 0x20a   : > { %978 = vperm.xlu0 %1451, %v970_v6  }
 0x25b   : > { %v1455_v19 = vpop.permute.xlu1 %1454 }
 0x25c   : > { %v1457_v21 = vunpack.i.h.bf16 %v1455_v19  ;;  %v1456_v22 = vunpack.i.l.bf16 %v1455_v19  ;;  %v1475_v23 = vpop.permute.xlu0 %1474 }
 0x25d   : > { %v1477_v25 = vunpack.i.h.bf16 %v1475_v23  ;;  %v1476_v26 = vunpack.i.l.bf16 %v1475_v23 }
 0x25f   : > { %v1460_v32 = vpop.permute.xlu1 %1459  ;;  %v689_v33 = vsel %vm314_vm6, %v1456_v22, %v1476_v26  ;;  %v690_v34 = vsel %vm314_vm6, %v1457_v21, %v1477_v25  ;;  %v691_v35 = vsel %vm314_vm6, %v1476_v26, %v1456_v22  ;;  %v692_v36 = vsel %vm314_vm6, %v1477_v25, %v1457_v21 }
 0x260   : > { %v1462_v38 = vunpack.i.h.bf16 %v1460_v32  ;;  %v1461_v39 = vunpack.i.l.bf16 %v1460_v32  ;;  %v1480_v40 = vpop.permute.xlu0 %1479  ;;  %v1243_v41 = vpack.c.bf16 %v690_v34, %v689_v33  ;;  %v1246_v42 = vpack.c.bf16 %v692_v36, %v691_v35 }
 0x261   : > { %v1482_v43 = vunpack.i.h.bf16 %v1480_v40  ;;  %v1481_v44 = vunpack.i.l.bf16 %v1480_v40  ;;  %vm2299_vm6 = vcmp.eq.s32.totalorder %v769_v30, 1  ;;  %v839_v25 = vrot.slane %v831_v7, %v1988_v15  ;;  %v1183_v40 = vld [vmem:[%s2517_s1 + $0x10] ss:$8 sm:$0x3] }
 0x262   : > { %1244 = vmatprep.subr.msk.bf16.mxu1 %vm1242_vm3, %v1243_v41  ;;  %vm1254_vm14 = vmpackc.low %vm2299_vm6, %vm2299_vm6  ;;  %v864_v26 = vsel %vm863_vm1, 1, %v1705_v0  ;;  %vm929_vm8 = vcmp.gt.f32.partialorder %v1183_v40, 0.5 }
 0x263   : > { %v722_v49 = vsel %vm348_vm5, %v1461_v39, %v1481_v44  ;;  %v723_v2 = vsel %vm348_vm5, %v1462_v38, %v1482_v43  ;;  %v724_v50 = vsel %vm348_vm5, %v1481_v44, %v1461_v39  ;;  %v725_v51 = vsel %vm348_vm5, %v1482_v43, %v1462_v38  ;;  %v1465_v52 = vpop.permute.xlu1 %1464  ;;  %1247 = vmatpush1.bf16.msk.msra.mxu1 %vm1245_vm11, %v1246_v42 }
 0x264   : > { %v1249_v54 = vpack.c.bf16 %v723_v2, %v722_v49  ;;  %v1252_v55 = vpack.c.bf16 %v725_v51, %v724_v50  ;;  %v1467_v56 = vunpack.i.h.bf16 %v1465_v52  ;;  %v1466_v57 = vunpack.i.l.bf16 %v1465_v52  ;;  %v1485_v58 = vpop.permute.xlu0 %1484 }
 0x265   : > { %v1487_v59 = vunpack.i.h.bf16 %v1485_v58  ;;  %v1486_v60 = vunpack.i.l.bf16 %v1485_v58  ;;  %vm2321_vm5 = vcmp.eq.s32.totalorder %v765_v46, 1  ;;  %vm896_vm11 = vcmp.gt.f32.partialorder %v1182_v13, 0.5 }
 0x266   : > { %1250 = vmatprep.subr.msk.bf16.mxu1 %vm1248_vm7, %v1249_v54  ;;  %vm1257_vm3 = vmpackc.low %vm2321_vm5, %vm2321_vm5  ;;  %v835_v39 = vrot.slane %v831_v7, %v1986_v14  ;;  %v872_v42 = vrot.slane %v864_v26, %v1988_v15  ;;  %v897_v43 = vsel %vm896_vm11, 1, %v1705_v0  ;;  %v868_v2 = vrot.slane %v864_v26, %v1986_v14 }
 0x267   : > { %v755_v8 = vsel %vm383_vm9, %v1466_v57, %v1486_v60  ;;  %v756_v9 = vsel %vm383_vm9, %v1467_v56, %v1487_v59  ;;  %v757_v10 = vsel %vm383_vm9, %v1486_v60, %v1466_v57  ;;  %v758_v11 = vsel %vm383_vm9, %v1487_v59, %v1467_v56  ;;  %v1470_v12 = vpop.permute.xlu1 %1469  ;;  %1253 = vmatpush1.bf16.msk.msra.mxu1 %vm1251_vm12, %v1252_v55 }
 0x268   : > { %v1255_v16 = vpack.c.bf16 %v756_v9, %v755_v8  ;;  %v1258_v18 = vpack.c.bf16 %v758_v11, %v757_v10  ;;  %v1472_v19 = vunpack.i.h.bf16 %v1470_v12  ;;  %v1471_v20 = vunpack.i.l.bf16 %v1470_v12  ;;  %v1490_v21 = vpop.permute.xlu0 %1489 }
 0x269   : > { %v1492_v22 = vunpack.i.h.bf16 %v1490_v21  ;;  %v1491_v23 = vunpack.i.l.bf16 %v1490_v21  ;;  %vm2349_vm9 = vcmp.eq.s32.totalorder %v798_v4, 1  ;;  %vm2390_vm12 = vcmp.eq.s32.totalorder %v835_v39, 1 }
 0x26a   : > { %1256 = vmatprep.subr.msk.bf16.mxu1 %vm1254_vm14, %v1255_v16  ;;  %vm1263_vm6 = vmpackc.low %vm2349_vm9, %vm2349_vm9  ;;  %v905_v53 = vrot.slane %v897_v43, %v1988_v15  ;;  %vm2399_vm5 = vcmp.eq.s32.totalorder %v872_v42, 1  ;;  %v930_v60 = vsel %vm929_vm8, 1, %v1705_v0  ;;  %vm2412_vm13 = vcmp.eq.s32.totalorder %v868_v2, 1  ;;  %v1539_v2 = vld [vmem:[%s1929_s12 + $0x10] sm:$0xff]  ;;  %s1626_s12 = scalar_lea.vmem %s2466_s17, 512 }
 0x26b   : > { %v788_v27 = vsel %vm418_vm10, %v1471_v20, %v1491_v23  ;;  %v789_v28 = vsel %vm418_vm10, %v1472_v19, %v1492_v22  ;;  %v790_v29 = vsel %vm418_vm10, %v1491_v23, %v1471_v20  ;;  %v791_v30 = vsel %vm418_vm10, %v1492_v22, %v1472_v19  ;;  %v1495_v31 = vpop.permute.xlu1 %1494  ;;  %1259 = vmatpush1.bf16.msk.msra.mxu1 %vm1257_vm3, %v1258_v18  ;;  %vm1272_vm1 = vmpackc.low %vm2399_vm5, %vm2399_vm5  ;;  %p1627_p11 = scmp.ne.s32.totalorder %s2466_s17, %s1626_s12  ;;  %p1634_p9 = scmp.lt.s32.totalorder %s1632_s8, %s1626_s12 }
 0x26c   : > { %v1261_v32 = vpack.c.bf16 %v789_v28, %v788_v27  ;;  %v1264_v33 = vpack.c.bf16 %v791_v30, %v790_v29  ;;  %v1497_v34 = vunpack.i.h.bf16 %v1495_v31  ;;  %v1496_v35 = vunpack.i.l.bf16 %v1495_v31  ;;  %v1515_v36 = vpop.permute.xlu0 %1514  ;;  %vm1275_vm11 = vmpackc.low %vm2412_vm13, %vm2412_vm13 }
 0x26d   : > { %v1517_v37 = vunpack.i.h.bf16 %v1515_v36  ;;  %v1516_v38 = vunpack.i.l.bf16 %v1515_v36  ;;  %vm2374_vm10 = vcmp.eq.s32.totalorder %v839_v25, 1  ;;  %v901_v8 = vrot.slane %v897_v43, %v1986_v14  ;;  %p1628_p1 = pnand %p1627_p11, %p2606_p0  ;;  %p1635_p12 = por %p1634_p9, %p1633_p7 }
 0x26e   : > { %1262 = vmatprep.subr.msk.bf16.mxu1 %vm1260_vm0, %v1261_v32  ;;  %vm1266_vm7 = vmpackc.low %vm2374_vm10, %vm2374_vm10  ;;  %vm2420_vm14 = vcmp.eq.s32.totalorder %v905_v53, 1  ;;  %v938_v16 = vrot.slane %v930_v60, %v1988_v15  ;;  %vm2599_vm3 = vcmp.lt.s32.totalorder %v1991_v17, 112  ;;  %v934_v27 = vrot.slane %v930_v60, %v1986_v14 }
 0x26f   : > { %v827_v44 = vsel %vm457_vm15, %v1516_v38, %v1496_v35  ;;  %v828_v45 = vsel %vm457_vm15, %v1517_v37, %v1497_v34  ;;  %v1500_v46 = vpop.permute.xlu1 %1499  ;;  %1265 = vmatpush1.bf16.msk.msra.mxu1 %vm1263_vm6, %v1264_v33  ;;  %v825_v54 = vsel %vm457_vm15, %v1496_v35, %v1516_v38  ;;  %vm2600_vm9 = vmmov %vm2599_vm3  ;;  %p1629_p3 = pneg %p1628_p1 }
 0x270   : > { %v1502_v47 = vunpack.i.h.bf16 %v1500_v46  ;;  %v1501_v48 = vunpack.i.l.bf16 %v1500_v46  ;;  %v1520_v49 = vpop.permute.xlu0 %1519  ;;  %1001 = vmatprep.subr.bf16.mxu1 %v2219_v61  ;;  %v826_v61 = vsel %vm457_vm15, %v1497_v34, %v1517_v37  ;;  %v1267_v55 = vpack.c.bf16 %v828_v45, %v827_v44  ;;  %vm1269_vm15 = vmpackc.low %vm2390_vm12, %vm2390_vm12  ;;  %v1536_v37 = vld [vmem:[#allocation8] ss:$8 sps:$4 sm:$0xff]  }
 0x271   : > { %v1522_v50 = vunpack.i.h.bf16 %v1520_v49  ;;  %v1521_v51 = vunpack.i.l.bf16 %v1520_v49  ;;  %v1270_v9 = vpack.c.bf16 %v826_v61, %v825_v54  ;;  %vm1278_vm0 = vmpackc.low %vm2420_vm14, %vm2420_vm14  ;;  %vm940_vm8 = vcmp.eq.s32.totalorder %v938_v16, 1  ;;  %p1636_p2 = pnand %p1635_p12, %p1629_p3 }
 0x272   : > { %vm2603_vm6 = vmmov %vm2599_vm3  ;;  %vm939_vm5 = vcmp.eq.s32.totalorder %v934_v27, 1 }
 0x273   : > { %v860_v57 = vsel %vm492_vm2, %v1521_v51, %v1501_v48  ;;  %v861_v58 = vsel %vm492_vm2, %v1522_v50, %v1502_v47  ;;  %v1505_v59 = vpop.permute.xlu1 %1504  ;;  %1002 = vmatpush1.bf16.msra.mxu1 %v2221_v62  ;;  %v858_v62 = vsel %vm492_vm2, %v1501_v48, %v1521_v51  ;;  %v859_v12 = vsel %vm492_vm2, %v1502_v47, %v1522_v50  ;;  %vm2604_vm10 = vmmov %vm2599_vm3 }
 0x274   : > { %v1507_v63 = vunpack.i.h.bf16 %v1505_v59  ;;  %v1506_v4 = vunpack.i.l.bf16 %v1505_v59  ;;  %v1525_v6 = vpop.permute.xlu0 %1524  ;;  %1268 = vmatprep.subr.msk.bf16.mxu1 %vm1266_vm7, %v1267_v55  ;;  %v1273_v13 = vpack.c.bf16 %v861_v58, %v860_v57  ;;  %vm2436_vm2 = vcmp.eq.s32.totalorder %v901_v8, 1  ;;  %vm1284_vm12 = vmpackc.low %vm940_vm8, %vm940_vm8 }
 0x275   : > { %v1527_v10 = vunpack.i.h.bf16 %v1525_v6  ;;  %v1526_v11 = vunpack.i.l.bf16 %v1525_v6  ;;  %v1276_v15 = vpack.c.bf16 %v859_v12, %v858_v62  ;;  %vm1281_vm7 = vmpackc.low %vm2436_vm2, %vm2436_vm2 }
 0x277   : > { %v893_v18 = vsel %vm2599_vm3, %v1526_v11, %v1506_v4  ;;  %v894_v19 = vsel %vm2600_vm9, %v1527_v10, %v1507_v63  ;;  %v1510_v20 = vpop.permute.xlu1 %1509  ;;  %1271 = vmatpush1.bf16.msk.msra.mxu1 %vm1269_vm15, %v1270_v9  ;;  %v891_v28 = vsel %vm2603_vm6, %v1506_v4, %v1526_v11  ;;  %v892_v29 = vsel %vm2604_vm10, %v1507_v63, %v1527_v10  ;;  %vm1287_vm15 = vmpackc.low %vm939_vm5, %vm939_vm5 }
 0x278   : > { %v1512_v21 = vunpack.i.h.bf16 %v1510_v20  ;;  %v1511_v22 = vunpack.i.l.bf16 %v1510_v20  ;;  %v1530_v23 = vpop.permute.xlu0 %1529  ;;  %1274 = vmatprep.subr.msk.bf16.mxu1 %vm1272_vm1, %v1273_v13  ;;  %v1279_v30 = vpack.c.bf16 %v894_v19, %v893_v18  ;;  %v1282_v14 = vpack.c.bf16 %v892_v29, %v891_v28 }
 0x279   : > { %v1532_v25 = vunpack.i.h.bf16 %v1530_v23  ;;  %v1531_v26 = vunpack.i.l.bf16 %v1530_v23 }
 0x27b   : > { %v926_v31 = vsel %vm562_vm4, %v1531_v26, %v1511_v22  ;;  %v927_v32 = vsel %vm562_vm4, %v1532_v25, %v1512_v21  ;;  %1277 = vmatpush1.bf16.msk.msra.mxu1 %vm1275_vm11, %v1276_v15  ;;  %v924_v33 = vsel %vm562_vm4, %v1511_v22, %v1531_v26  ;;  %v925_v34 = vsel %vm562_vm4, %v1512_v21, %v1532_v25 }
 0x27c   : > { %1280 = vmatprep.subr.msk.bf16.mxu1 %vm1278_vm0, %v1279_v30  ;;  %v1285_v35 = vpack.c.bf16 %v927_v32, %v926_v31  ;;  %v1288_v36 = vpack.c.bf16 %v925_v34, %v924_v33 }
 0x27f   : > { %1283 = vmatpush1.bf16.msk.msra.mxu1 %vm1281_vm7, %v1282_v14 }
 0x280   : > { %1286 = vmatprep.subr.msk.bf16.mxu1 %vm1284_vm12, %v1285_v35 }
 0x283   : > { %1289 = vmatpush1.bf16.msk.msra.mxu1 %vm1287_vm15, %v1288_v36 }
 0x286   : > { %1026 = vmatmul.mubr.bf16.vlgmr.msra.gmra.mrb[0].mxu1 %v1536_v37 }
 0x288   : > { %v974_v38 = vpop.permute.xlu1 %973 }
 0x289   : > { %v979_v42 = vpop.permute.xlu0 %978 }
 0x359   : > { %v1027_v39 = vpop.f32.mrb[0].mxu1 }
 0x35a   : > { %v1028_v40 = vadd.f32 %v1027_v39, %v974_v38  ;;  %v1029_v41 = vpop.f32.mrb[1].mxu1 }
 0x35b   : > { %v1030_v43 = vadd.f32 %v1029_v41, %v974_v38  ;;  %v1031_v44 = vpop.f32.mrb[2].mxu1 }
 0x35c   : > { %v1036_v17 = vadd.f32 %v1028_v40, %v1942_v1  ;;  %v1032_v45 = vadd.f32 %v1031_v44, %v979_v42  ;;  %v1033_v46 = vpop.f32.mrb[3].mxu1 }
 0x35d   : > { %v1037_v47 = vadd.f32 %v1030_v43, %v1948_v3  ;;  %v1034_v48 = vadd.f32 %v1033_v46, %v979_v42 }
 0x35e   : > { %v1040_v49 = vmax.f32 %v1036_v17, 0.0  ;;  %v1038_v50 = vadd.f32 %v1539_v2, %v1032_v45 }
 0x35f   : > { %v1041_v51 = vmax.f32 %v1037_v47, 0.0  ;;  %v1039_v52 = vadd.f32 %v1034_v48, %v1953_v5 }
 0x360   : > { %1044 = vst [vmem:[%s298_s29] sm:$0xff] %v1040_v49  ;;  %v1042_v1 = vmax.f32 %v1038_v50, 0.0 }
 0x361   : > { %1045 = vst [vmem:[%s298_s29 + $0x8] sm:$0xff] %v1041_v51  ;;  %v1043_v53 = vmax.f32 %v1039_v52, 0.0 }
 0x362   : > { %1046 = vst [vmem:[%s298_s29 + $0x10] sm:$0xff] %v1042_v1 }
 0x363   : > { %1047 = vst [vmem:[%s298_s29 + $0x18] sm:$0xff] %v1043_v53 }
 0x364   : > { %1639 = shalt.err (!%p1636_p2)
}
 0x365   : > { %s1640_s18 = scalar_lea.hbm %s2471_s7, 512  ;;  %s1644_s29 = scalar_lea.hbm %s2522_s6, 1024 }
 0x366   : > { %p1641_p13 = scmp.ne.s32.totalorder %s2471_s7, %s1640_s18  ;;  %p1645_p4 = scmp.lt.u32.totalorder %s2471_s7, %s2522_s6 }
 0x367   : > { %p1646_p5 = scmp.lt.u32.totalorder %s1644_s29, %s1640_s18  ;;  %p1648_p11 = scmp.lt.u32.totalorder %s1640_s18, %s2471_s7 }
 0x368   : > { %p1642_p6 = pnand %p1641_p13, %p2606_p0 }
 0x369   : > { %p1647_p8 = por %p1646_p5, %p1645_p4 }
 0x36a   : > { %p1643_p10 = pneg %p1642_p6 }
 0x36b   : > { %p1649_p1 = por %p1648_p11, %p1647_p8 }
 0x36d   : > { %p1650_p3 = pnand %p1649_p1, %p1643_p10 }
 0x36f   : > { %1653 = shalt.err (!%p1650_p3)
}
 0x370   : > { %s1715_s16 = smov 256  }
 0x371   : > { %1300 = dma.vmem_to_hbm [thread:$0]  (%p2606_p0), %s2466_s17, 512, %s2471_s7, %s1049_s25, %s1715_s16, %s1715_s16, %s1706_s27  }
 0x372 PF: > { %s1077_s12 = sand.u32 1, %s1684_s21   ;;  %p2607_p7 = scmp.ne.s32.totalorder %s2535_s28, 0 }
 0x373   : > { %p2608_p9 = scmp.ge.s32.totalorder %s1696_s24, 2  ;;  %s1078_s30 = scalar_lea.sflag [#allocation5], %s1077_s12 }
 0x375   : > { %p1314_p12 = pnand %p2608_p9, %p2607_p7 }
 0x377   : > { %1679 = dma.done.wait (!%p1314_p12), %s1078_s30, 512  }
 0x378   : > { %1681 = vsyncadd (!%p1314_p12), %s1078_s30, 4294966784  ;;  %p20_p2 = scmp.ge.s32.totalorder %s1861_s26, 4   ;;  %s2609_s21 = smov %s1688_s22 }
 0x379   : > { %s2610_s22 = smov %s1692_s23  ;;  %s2611_s23 = smov %s1877_s11 }
 0x37a   : > { %s2612_s24 = smov %s1861_s26  ;;  %22 = sbr.rel (!%p20_p2) target bundleno = 6 (0x6), region = 104 }
 0x381   :  { %1083 = vsyncpa [#allocation4], 1 }
 0x382   :  { %1085 = vsyncpa [#allocation4 + $0x1], 1 }
 0x383   :  { %1086 = vsyncpa [#allocation7], 1 }
 0x384   :  { %1087 = vsyncpa [#allocation5], 1 }
 0x385   :  { %1089 = vsyncpa [#allocation5 + $0x1], 1 }

</bundles_post_ra>
